<compile_context>
chip_gen: v5e
topology: v5e:2x2
jax: 0.10.0
libtpu: 0.0.40
codegen_flags: <defaults>
</compile_context>

<pallas_src>
import functools

import jax
import jax.numpy as jnp
from jax.experimental import pallas as pl
from jax.experimental.pallas import tpu as pltpu

EPS = 1e-5
LANE = 128                     # lane-dense Cout padding / aligned-concat unit
KPACK = 16                     # bf16 packing multiple for the contraction dim
MAX_EPILOGUE_ROWS = 2048       # flattened-M tile cap for the elementwise passes


def _round_up(v, m):
    return (v + m - 1) // m * m


def _vmem_limit_bytes():
    """VMEM scoped limit: ~half of physical, clamped to [32, 96] MiB."""
    cap = 128 * 1024 * 1024
    try:
        info = pltpu.get_tpu_info()
        for name in ("vmem_capacity_bytes", "vmem_bytes", "vmem_size_bytes"):
            v = getattr(info, name, None)
            if v:
                cap = int(v)
                break
    except Exception:
        pass
    return int(min(max(cap // 2, 32 * 1024 * 1024), 96 * 1024 * 1024))


def _pick_tile_rows(m_total, cout_p, vmem_limit, n_bufs=6):
    """Largest multiple-of-8 divisor of M under the row cap / VMEM budget."""
    row_bytes = n_bufs * cout_p * 2 * 2           # bf16 tiles, double-buffered
    cap = max(8, min(m_total, MAX_EPILOGUE_ROWS,
                     (vmem_limit // 2) // max(row_bytes, 1)))
    best = None
    t = 8
    while t <= cap:
        if m_total % t == 0:
            best = t
        t += 8
    return best if best is not None else m_total


# ----------------------------- Pallas kernels ------------------------------ #

def _conv_stats_concat_kernel(x_ref, w_ref, y_ref, psum_ref, pssq_ref, lhs_ref,
                              *, k, s, Ho, Wo):
    """KxK conv as ONE big-K matmul + per-image BN partial sums.

    x_ref   : (s*s, Hph, Wph, Cin_p)      bf16 phase-decomposed padded image
    w_ref   : (k*k*Cin_p, Cout_p)         bf16 tap-concatenated weights
    y_ref   : (1, Ho*Wo, Cout_p)          bf16 raw (pre-BN) conv output
    psum/pssq : (1, 1, Cout_p)            f32 per-image partial statistics
    lhs_ref : (Ho*Wo, k*k*Cin_p)          bf16 VMEM staging buffer (scratch)
    """
    cin_p = x_ref.shape[-1]
    # Stage the k*k shifted tap slabs into the K-concatenated LHS buffer.
    # (lane offsets t*cin_p are multiples of 128 on this path -> aligned.)
    for di in range(k):
        for dj in range(k):
            t = di * k + dj
            ph = (di % s) * s + (dj % s)
            oi, oj = di // s, dj // s
            slab = x_ref[ph, oi:oi + Ho, oj:oj + Wo, :].astype(jnp.float32)
            lhs_ref[:, t * cin_p:(t + 1) * cin_p] = (
                slab.reshape(Ho * Wo, cin_p).astype(lhs_ref.dtype))
    # One MXU matmul with K = k*k*Cin_p (fills the contraction depth).
    acc = jnp.dot(lhs_ref[...], w_ref[...], preferred_element_type=jnp.float32)
    y_ref[0] = acc.astype(y_ref.dtype)
    psum_ref[0] = jnp.sum(acc, axis=0, keepdims=True)
    pssq_ref[0] = jnp.sum(acc * acc, axis=0, keepdims=True)


def _conv_stats_tap_kernel(x_ref, w_ref, y_ref, psum_ref, pssq_ref, acc_ref,
                           *, k, s, Ho, Wo):
    """Fallback (small / lane-unaligned Cin): per-tap matmuls into a VMEM acc."""
    cin_p = x_ref.shape[-1]
    acc_ref[...] = jnp.zeros_like(acc_ref)
    for di in range(k):
        for dj in range(k):
            ph = (di % s) * s + (dj % s)
            oi, oj = di // s, dj // s
            slab = x_ref[ph, oi:oi + Ho, oj:oj + Wo, :].astype(jnp.float32)
            lhs = slab.reshape(Ho * Wo, cin_p).astype(jnp.bfloat16)
            acc_ref[...] += jnp.dot(lhs, w_ref[di * k + dj],
                                    preferred_element_type=jnp.float32)
    acc = acc_ref[...]
    y_ref[0] = acc.astype(y_ref.dtype)
    psum_ref[0] = jnp.sum(acc, axis=0, keepdims=True)
    pssq_ref[0] = jnp.sum(acc * acc, axis=0, keepdims=True)


def _scale_shift_kernel(y_ref, sc_ref, sh_ref, o_ref, *, relu):
    """Apply precomputed BN scale/shift (+ ReLU) to one flattened-M tile."""
    z = y_ref[...].astype(jnp.float32) * sc_ref[...] + sh_ref[...]
    if relu:
        z = jnp.maximum(z, 0.0)
    o_ref[...] = z.astype(o_ref.dtype)


def _scale_shift_add_relu_kernel(y_ref, sc_ref, sh_ref, r_ref, scr_ref, shr_ref,
                                 o_ref):
    """Fused epilogue: BN(main) + BN/identity(shortcut) + add + ReLU."""
    y = y_ref[...].astype(jnp.float32) * sc_ref[...] + sh_ref[...]
    r = r_ref[...].astype(jnp.float32) * scr_ref[...] + shr_ref[...]
    o_ref[...] = jnp.maximum(y + r, 0.0).astype(o_ref.dtype)


# ----------------------------- pallas_call wrappers ------------------------ #

def conv_bn_stats(phases, w_taps, *, k, s, n_imgs, Ho, Wo, vmem_limit):
    """Conv (+ per-image BN partial stats).  Grid = images, fully parallel."""
    sq = phases.shape[0] // n_imgs
    _, hph, wph, cin_p = phases.shape
    cout_p = w_taps.shape[-1]
    mi = Ho * Wo
    use_concat = (k > 1) and (cin_p % LANE == 0)

    if use_concat:
        w_in = w_taps.reshape(k * k * cin_p, cout_p)
        w_spec = pl.BlockSpec((k * k * cin_p, cout_p), lambda n: (0, 0))
        kern = functools.partial(_conv_stats_concat_kernel, k=k, s=s, Ho=Ho, Wo=Wo)
        scratch = [pltpu.VMEM((mi, k * k * cin_p), jnp.bfloat16)]
    else:
        w_in = w_taps
        w_spec = pl.BlockSpec((k * k, cin_p, cout_p), lambda n: (0, 0, 0))
        kern = functools.partial(_conv_stats_tap_kernel, k=k, s=s, Ho=Ho, Wo=Wo)
        scratch = [pltpu.VMEM((mi, cout_p), jnp.float32)]

    return pl.pallas_call(
        kern,
        grid=(n_imgs,),
        in_specs=[
            pl.BlockSpec((sq, hph, wph, cin_p), lambda n: (n, 0, 0, 0)),
            w_spec,
        ],
        out_specs=(
            pl.BlockSpec((1, mi, cout_p), lambda n: (n, 0, 0)),
            pl.BlockSpec((1, 1, cout_p), lambda n: (n, 0, 0)),
            pl.BlockSpec((1, 1, cout_p), lambda n: (n, 0, 0)),
        ),
        out_shape=(
            jax.ShapeDtypeStruct((n_imgs, mi, cout_p), jnp.bfloat16),
            jax.ShapeDtypeStruct((n_imgs, 1, cout_p), jnp.float32),
            jax.ShapeDtypeStruct((n_imgs, 1, cout_p), jnp.float32),
        ),
        scratch_shapes=scratch,
        compiler_params=pltpu.CompilerParams(
            dimension_semantics=("parallel",),        # no cross-step state
            vmem_limit_bytes=vmem_limit),
    )(phases, w_in)


def bn_act(y2d, scale, shift, *, relu, vmem_limit):
    m_total, cp = y2d.shape
    tm = _pick_tile_rows(m_total, cp, vmem_limit)
    kern = functools.partial(_scale_shift_kernel, relu=relu)
    return pl.pallas_call(
        kern,
        grid=(m_total // tm,),
        in_specs=[pl.BlockSpec((tm, cp), lambda i: (i, 0)),
                  pl.BlockSpec((1, cp), lambda i: (0, 0)),
                  pl.BlockSpec((1, cp), lambda i: (0, 0))],
        out_specs=pl.BlockSpec((tm, cp), lambda i: (i, 0)),
        out_shape=jax.ShapeDtypeStruct((m_total, cp), jnp.bfloat16),
        compiler_params=pltpu.CompilerParams(
            dimension_semantics=("parallel",),
            vmem_limit_bytes=vmem_limit),
    )(y2d, scale, shift)


def bn_add_relu(y2d, scale, shift, r2d, scale_r, shift_r, *, vmem_limit):
    m_total, cp = y2d.shape
    tm = _pick_tile_rows(m_total, cp, vmem_limit)
    return pl.pallas_call(
        _scale_shift_add_relu_kernel,
        grid=(m_total // tm,),
        in_specs=[pl.BlockSpec((tm, cp), lambda i: (i, 0)),
                  pl.BlockSpec((1, cp), lambda i: (0, 0)),
                  pl.BlockSpec((1, cp), lambda i: (0, 0)),
                  pl.BlockSpec((tm, cp), lambda i: (i, 0)),
                  pl.BlockSpec((1, cp), lambda i: (0, 0)),
                  pl.BlockSpec((1, cp), lambda i: (0, 0))],
        out_specs=pl.BlockSpec((tm, cp), lambda i: (i, 0)),
        out_shape=jax.ShapeDtypeStruct((m_total, cp), jnp.bfloat16),
        compiler_params=pltpu.CompilerParams(
            dimension_semantics=("parallel",),
            vmem_limit_bytes=vmem_limit),
    )(y2d, scale, shift, r2d, scale_r, shift_r)


# ------------------------------- JAX glue ---------------------------------- #

def _pad_channels(x, cp):
    c = x.shape[-1]
    if c == cp:
        return x
    return jnp.pad(x, ((0, 0),) * (x.ndim - 1) + ((0, cp - c),))


def make_phases(xp, k, s):
    """Phase-decompose a spatially padded NHWC tensor so every conv tap is a
    unit-stride window inside the kernel (~1x-size XLA data movement, NOT an
    im2col).  Returns (N*s*s, Hph, Wph, C), Ho, Wo with
      phases[n*s*s + p*s + q, i, j, :] == xp[n, i*s + p, j*s + q, :].
    """
    n, hp, wp, c = xp.shape
    ho = (hp - k) // s + 1
    wo = (wp - k) // s + 1
    if s == 1:
        return xp, ho, wo
    hph = (k - 1) // s + ho
    wph = (k - 1) // s + wo
    eh = max(0, s * hph - hp)
    ew = max(0, s * wph - wp)
    xpe = jnp.pad(xp, ((0, 0), (0, eh), (0, ew), (0, 0)))
    parts = [xpe[:, p::s, q::s, :][:, :hph, :wph, :]
             for p in range(s) for q in range(s)]
    ph = jnp.stack(parts, axis=1)                     # (N, s*s, Hph, Wph, C)
    return ph.reshape(n * s * s, hph, wph, c), ho, wo


def _w_taps(w_oihw, cin_p, cout_p):
    """[Cout, Cin, kh, kw] -> (kh*kw, Cin_p, Cout_p) bf16, tap t = di*kw + dj."""
    co, ci, kh, kw = w_oihw.shape
    w = jnp.transpose(w_oihw, (2, 3, 1, 0)).reshape(kh * kw, ci, co)
    w = jnp.pad(w, ((0, 0), (0, cin_p - ci), (0, cout_p - co)))
    return w.astype(jnp.bfloat16)


def _bn_affine(psum, pssq, m, gamma, beta, cout_p):
    """Reduce per-image partial sums into BN scale/shift (tiny XLA op)."""
    s = jnp.sum(psum, axis=0)                 # (1, Cout_p)
    q = jnp.sum(pssq, axis=0)
    mean = s / m
    var = jnp.maximum(q / m - mean * mean, 0.0)
    g = jnp.pad(gamma, (0, cout_p - gamma.shape[0])).reshape(1, cout_p)
    b = jnp.pad(beta, (0, cout_p - beta.shape[0])).reshape(1, cout_p)
    scale = g * jax.lax.rsqrt(var + EPS)
    shift = b - mean * scale
    return scale.astype(jnp.float32), shift.astype(jnp.float32)


def init_params(key, in_channels, out_channels, stride):
    k1, k2, k3 = jax.random.split(key, 3)
    params = {
        "w1": 0.1 * jax.random.normal(k1, (out_channels, in_channels, 3, 3), jnp.float32),
        "g1": jnp.ones((out_channels,), jnp.float32),
        "b1": jnp.zeros((out_channels,), jnp.float32),
        "w2": 0.1 * jax.random.normal(k2, (out_channels, out_channels, 3, 3), jnp.float32),
        "g2": jnp.ones((out_channels,), jnp.float32),
        "b2": jnp.zeros((out_channels,), jnp.float32),
    }
    if stride != 1 or in_channels != out_channels:
        params["wsc"] = 0.1 * jax.random.normal(
            k3, (out_channels, in_channels, 1, 1), jnp.float32)
        params["gsc"] = jnp.ones((out_channels,), jnp.float32)
        params["bsc"] = jnp.zeros((out_channels,), jnp.float32)
    return params


def residual_block(x_nchw, params, stride):
    vmem = _vmem_limit_bytes()
    x = jnp.transpose(x_nchw, (0, 2, 3, 1)).astype(jnp.float32)   # NHWC
    n, h, w, cin = x.shape
    cout = params["w1"].shape[0]
    cin_p = _round_up(cin, KPACK)
    cout_p = _round_up(cout, LANE)          # lane-dense output channel axis

    # ---- main branch: conv3x3(stride) + BN(batch stats) + ReLU -------------
    xp = _pad_channels(jnp.pad(x, ((0, 0), (1, 1), (1, 1), (0, 0))),
                       cin_p).astype(jnp.bfloat16)
    ph1, ho, wo = make_phases(xp, 3, stride)
    w1 = _w_taps(params["w1"], cin_p, cout_p)
    y1, s1, q1 = conv_bn_stats(ph1, w1, k=3, s=stride, n_imgs=n, Ho=ho, Wo=wo,
                               vmem_limit=vmem)
    m = n * ho * wo
    sc1, sh1 = _bn_affine(s1, q1, m, params["g1"], params["b1"], cout_p)
    y1n = bn_act(y1.reshape(m, cout_p), sc1, sh1, relu=True, vmem_limit=vmem)

    # ---- main branch: conv3x3(1) + BN(batch stats) ---------------------------
    y1p = jnp.pad(y1n.reshape(n, ho, wo, cout_p),
                  ((0, 0), (1, 1), (1, 1), (0, 0)))
    w2 = _w_taps(params["w2"], cout_p, cout_p)
    y2, s2, q2 = conv_bn_stats(y1p, w2, k=3, s=1, n_imgs=n, Ho=ho, Wo=wo,
                               vmem_limit=vmem)
    sc2, sh2 = _bn_affine(s2, q2, m, params["g2"], params["b2"], cout_p)

    # ---- shortcut branch -----------------------------------------------------
    if "wsc" in params:
        xs = _pad_channels(x[:, ::stride, ::stride, :], cin_p).astype(jnp.bfloat16)
        wsc = _w_taps(params["wsc"], cin_p, cout_p)
        r, ss, qs = conv_bn_stats(xs, wsc, k=1, s=1, n_imgs=n, Ho=ho, Wo=wo,
                                  vmem_limit=vmem)
        scr, shr = _bn_affine(ss, qs, m, params["gsc"], params["bsc"], cout_p)
        r2d = r.reshape(m, cout_p)
    else:
        r2d = _pad_channels(x, cout_p).astype(jnp.bfloat16).reshape(m, cout_p)
        scr = jnp.ones((1, cout_p), jnp.float32)
        shr = jnp.zeros((1, cout_p), jnp.float32)

    # ---- fused BN + residual add + ReLU epilogue (bf16, flattened M) ---------
    out = bn_add_relu(y2.reshape(m, cout_p), sc2, sh2, r2d, scr, shr,
                      vmem_limit=vmem)
    out = out.reshape(n, ho, wo, cout_p)[..., :cout].astype(jnp.float32)
    return jnp.transpose(out, (0, 3, 1, 2))            # back to NCHW


# ------------------------- pure-JAX reference check ------------------------ #

def reference(x, params, stride):
    dn = ("NCHW", "OIHW", "NCHW")

    def bn(y, g, b):
        mu = jnp.mean(y, axis=(0, 2, 3), keepdims=True)
        v = jnp.mean(jnp.square(y - mu), axis=(0, 2, 3), keepdims=True)
        return (y - mu) * jax.lax.rsqrt(v + EPS) * g.reshape(1, -1, 1, 1) \
            + b.reshape(1, -1, 1, 1)

    y = jax.lax.conv_general_dilated(x, params["w1"], (stride, stride),
                                     ((1, 1), (1, 1)), dimension_numbers=dn)
    y = jnp.maximum(bn(y, params["g1"], params["b1"]), 0.0)
    y = jax.lax.conv_general_dilated(y, params["w2"], (1, 1),
                                     ((1, 1), (1, 1)), dimension_numbers=dn)
    y = bn(y, params["g2"], params["b2"])
    if "wsc" in params:
        s = jax.lax.conv_general_dilated(x, params["wsc"], (stride, stride),
                                         ((0, 0), (0, 0)), dimension_numbers=dn)
        s = bn(s, params["gsc"], params["bsc"])
    else:
        s = x
    return jnp.maximum(y + s, 0.0)


# ---------------------------------- main ----------------------------------- #

if __name__ == "__main__":
    key = jax.random.PRNGKey(0)
    kx, kp1, kp2 = jax.random.split(key, 3)

    # case 1: downsampling block (stride=2, channel change) -> conv shortcut
    in_c, out_c, stride = 4, 8, 2
    x = jax.random.normal(kx, (2, in_c, 16, 16), jnp.float32)
    params = init_params(kp1, in_c, out_c, stride)
    out = jax.block_until_ready(residual_block(x, params, stride))
    ref = reference(x, params, stride)
    assert out.shape == (2, out_c, 8, 8)
    assert jnp.allclose(out, ref, atol=1e-1, rtol=1e-1), \
        f"max |diff| = {float(jnp.max(jnp.abs(out - ref)))}"

    # case 2: identity shortcut (stride=1, same channels)
    in_c2 = out_c2 = 8
    x2 = jax.random.normal(kx, (2, in_c2, 16, 16), jnp.float32)
    params2 = init_params(kp2, in_c2, out_c2, 1)
    out2 = jax.block_until_ready(residual_block(x2, params2, 1))
    ref2 = reference(x2, params2, 1)
    assert out2.shape == (2, out_c2, 16, 16)
    assert jnp.allclose(out2, ref2, atol=1e-1, rtol=1e-1), \
        f"max |diff| = {float(jnp.max(jnp.abs(out2 - ref2)))}"

    print("KERNEL_OK")
</pallas_src>

<mosaic_0001>
module attributes {stable_mosaic.version = 11 : i64} {
  func.func @_conv_stats_tap_kernel(%arg0: i32, %arg1: memref<4x9x9x16xbf16, #tpu.memory_space<vmem>>, %arg2: memref<9x16x128xbf16, #tpu.memory_space<vmem>>, %arg3: memref<1x64x128xbf16, #tpu.memory_space<vmem>>, %arg4: memref<1x1x128xf32, #tpu.memory_space<vmem>>, %arg5: memref<1x1x128xf32, #tpu.memory_space<vmem>>, %arg6: memref<64x128xf32, #tpu.memory_space<vmem>>) attributes {dimension_semantics = [#tpu.dimension_semantics<parallel>], iteration_bounds = array<i64: 2>, scalar_prefetch = 0 : i64, scratch_operands = 1 : i64, tpu.core_type = #tpu.core_type<tc>, window_params = [{transform_indices = @transform_0, window_bounds = array<i64: 4, 9, 9, 16>}, {pipeline_mode = #tpu.pipeline_mode<synchronous>, transform_indices = @transform_1, window_bounds = array<i64: 9, 16, 128>}, {transform_indices = @transform_2, window_bounds = array<i64: 1, 64, 128>}, {transform_indices = @transform_3, window_bounds = array<i64: 1, 1, 128>}, {transform_indices = @transform_4, window_bounds = array<i64: 1, 1, 128>}]} {
    %cst = arith.constant 0.000000e+00 : f32
    %0 = vector.broadcast %cst : f32 to vector<64x128xf32>
    %c0 = arith.constant 0 : index
    %c0_0 = arith.constant 0 : index
    %1 = vector.load %arg6[%c0, %c0_0] : memref<64x128xf32, #tpu.memory_space<vmem>>, vector<64x128xf32>
    tpu.vector_store %arg6[%c0, %c0_0], %0 {strides = array<i32>} : memref<64x128xf32, #tpu.memory_space<vmem>>, vector<64x128xf32>,
    %c0_1 = arith.constant 0 : index
    %c0_2 = arith.constant 0 : index
    %c0_3 = arith.constant 0 : index
    %c0_4 = arith.constant 0 : index
    %2 = vector.load %arg1[%c0_1, %c0_2, %c0_3, %c0_4] : memref<4x9x9x16xbf16, #tpu.memory_space<vmem>>, vector<1x8x8x16xbf16>
    %3 = vector.shape_cast %2 : vector<1x8x8x16xbf16> to vector<8x8x16xbf16>
    %4 = arith.extf %3 : vector<8x8x16xbf16> to vector<8x8x16xf32>
    %5 = vector.shape_cast %4 : vector<8x8x16xf32> to vector<64x16xf32>
    %6 = arith.truncf %5 : vector<64x16xf32> to vector<64x16xbf16>
    %c0_5 = arith.constant 0 : index
    %c0_6 = arith.constant 0 : index
    %7 = vector.load %arg6[%c0_5, %c0_6] : memref<64x128xf32, #tpu.memory_space<vmem>>, vector<64x128xf32>
    %c0_7 = arith.constant 0 : index
    %c0_8 = arith.constant 0 : index
    %c0_9 = arith.constant 0 : index
    %8 = vector.load %arg2[%c0_7, %c0_8, %c0_9] : memref<9x16x128xbf16, #tpu.memory_space<vmem>>, vector<1x16x128xbf16>
    %9 = vector.shape_cast %8 : vector<1x16x128xbf16> to vector<16x128xbf16>
    %cst_10 = arith.constant dense<0.000000e+00> : vector<64x128xf32>
    %10 = tpu.matmul %6, %9, %cst_10 {dimension_numbers = #tpu.dot_dimension_numbers<[1], [0], [0], [1], [0, 0, 1, 1], [], []>} : vector<64x16xbf16>, vector<16x128xbf16>, vector<64x128xf32> -> vector<64x128xf32>
    %11 = arith.addf %7, %10 : vector<64x128xf32>
    %c0_11 = arith.constant 0 : index
    %c0_12 = arith.constant 0 : index
    %12 = vector.load %arg6[%c0_11, %c0_12] : memref<64x128xf32, #tpu.memory_space<vmem>>, vector<64x128xf32>
    tpu.vector_store %arg6[%c0_11, %c0_12], %11 {strides = array<i32>} : memref<64x128xf32, #tpu.memory_space<vmem>>, vector<64x128xf32>,
    %c1 = arith.constant 1 : index
    %c0_13 = arith.constant 0 : index
    %c0_14 = arith.constant 0 : index
    %c0_15 = arith.constant 0 : index
    %13 = vector.load %arg1[%c1, %c0_13, %c0_14, %c0_15] : memref<4x9x9x16xbf16, #tpu.memory_space<vmem>>, vector<1x8x8x16xbf16>
    %14 = vector.shape_cast %13 : vector<1x8x8x16xbf16> to vector<8x8x16xbf16>
    %15 = arith.extf %14 : vector<8x8x16xbf16> to vector<8x8x16xf32>
    %16 = vector.shape_cast %15 : vector<8x8x16xf32> to vector<64x16xf32>
    %17 = arith.truncf %16 : vector<64x16xf32> to vector<64x16xbf16>
    %c0_16 = arith.constant 0 : index
    %c0_17 = arith.constant 0 : index
    %18 = vector.load %arg6[%c0_16, %c0_17] : memref<64x128xf32, #tpu.memory_space<vmem>>, vector<64x128xf32>
    %c1_18 = arith.constant 1 : index
    %c0_19 = arith.constant 0 : index
    %c0_20 = arith.constant 0 : index
    %19 = vector.load %arg2[%c1_18, %c0_19, %c0_20] : memref<9x16x128xbf16, #tpu.memory_space<vmem>>, vector<1x16x128xbf16>
    %20 = vector.shape_cast %19 : vector<1x16x128xbf16> to vector<16x128xbf16>
    %cst_21 = arith.constant dense<0.000000e+00> : vector<64x128xf32>
    %21 = tpu.matmul %17, %20, %cst_21 {dimension_numbers = #tpu.dot_dimension_numbers<[1], [0], [0], [1], [0, 0, 1, 1], [], []>} : vector<64x16xbf16>, vector<16x128xbf16>, vector<64x128xf32> -> vector<64x128xf32>
    %22 = arith.addf %18, %21 : vector<64x128xf32>
    %c0_22 = arith.constant 0 : index
    %c0_23 = arith.constant 0 : index
    %23 = vector.load %arg6[%c0_22, %c0_23] : memref<64x128xf32, #tpu.memory_space<vmem>>, vector<64x128xf32>
    tpu.vector_store %arg6[%c0_22, %c0_23], %22 {strides = array<i32>} : memref<64x128xf32, #tpu.memory_space<vmem>>, vector<64x128xf32>,
    %c0_24 = arith.constant 0 : index
    %c0_25 = arith.constant 0 : index
    %c1_26 = arith.constant 1 : index
    %c0_27 = arith.constant 0 : index
    %24 = vector.load %arg1[%c0_24, %c0_25, %c1_26, %c0_27] : memref<4x9x9x16xbf16, #tpu.memory_space<vmem>>, vector<1x8x8x16xbf16>
    %25 = vector.shape_cast %24 : vector<1x8x8x16xbf16> to vector<8x8x16xbf16>
    %26 = arith.extf %25 : vector<8x8x16xbf16> to vector<8x8x16xf32>
    %27 = vector.shape_cast %26 : vector<8x8x16xf32> to vector<64x16xf32>
    %28 = arith.truncf %27 : vector<64x16xf32> to vector<64x16xbf16>
    %c0_28 = arith.constant 0 : index
    %c0_29 = arith.constant 0 : index
    %29 = vector.load %arg6[%c0_28, %c0_29] : memref<64x128xf32, #tpu.memory_space<vmem>>, vector<64x128xf32>
    %c2 = arith.constant 2 : index
    %c0_30 = arith.constant 0 : index
    %c0_31 = arith.constant 0 : index
    %30 = vector.load %arg2[%c2, %c0_30, %c0_31] : memref<9x16x128xbf16, #tpu.memory_space<vmem>>, vector<1x16x128xbf16>
    %31 = vector.shape_cast %30 : vector<1x16x128xbf16> to vector<16x128xbf16>
    %cst_32 = arith.constant dense<0.000000e+00> : vector<64x128xf32>
    %32 = tpu.matmul %28, %31, %cst_32 {dimension_numbers = #tpu.dot_dimension_numbers<[1], [0], [0], [1], [0, 0, 1, 1], [], []>} : vector<64x16xbf16>, vector<16x128xbf16>, vector<64x128xf32> -> vector<64x128xf32>
    %33 = arith.addf %29, %32 : vector<64x128xf32>
    %c0_33 = arith.constant 0 : index
    %c0_34 = arith.constant 0 : index
    %34 = vector.load %arg6[%c0_33, %c0_34] : memref<64x128xf32, #tpu.memory_space<vmem>>, vector<64x128xf32>
    tpu.vector_store %arg6[%c0_33, %c0_34], %33 {strides = array<i32>} : memref<64x128xf32, #tpu.memory_space<vmem>>, vector<64x128xf32>,
    %c2_35 = arith.constant 2 : index
    %c0_36 = arith.constant 0 : index
    %c0_37 = arith.constant 0 : index
    %c0_38 = arith.constant 0 : index
    %35 = vector.load %arg1[%c2_35, %c0_36, %c0_37, %c0_38] : memref<4x9x9x16xbf16, #tpu.memory_space<vmem>>, vector<1x8x8x16xbf16>
    %36 = vector.shape_cast %35 : vector<1x8x8x16xbf16> to vector<8x8x16xbf16>
    %37 = arith.extf %36 : vector<8x8x16xbf16> to vector<8x8x16xf32>
    %38 = vector.shape_cast %37 : vector<8x8x16xf32> to vector<64x16xf32>
    %39 = arith.truncf %38 : vector<64x16xf32> to vector<64x16xbf16>
    %c0_39 = arith.constant 0 : index
    %c0_40 = arith.constant 0 : index
    %40 = vector.load %arg6[%c0_39, %c0_40] : memref<64x128xf32, #tpu.memory_space<vmem>>, vector<64x128xf32>
    %c3 = arith.constant 3 : index
    %c0_41 = arith.constant 0 : index
    %c0_42 = arith.constant 0 : index
    %41 = vector.load %arg2[%c3, %c0_41, %c0_42] : memref<9x16x128xbf16, #tpu.memory_space<vmem>>, vector<1x16x128xbf16>
    %42 = vector.shape_cast %41 : vector<1x16x128xbf16> to vector<16x128xbf16>
    %cst_43 = arith.constant dense<0.000000e+00> : vector<64x128xf32>
    %43 = tpu.matmul %39, %42, %cst_43 {dimension_numbers = #tpu.dot_dimension_numbers<[1], [0], [0], [1], [0, 0, 1, 1], [], []>} : vector<64x16xbf16>, vector<16x128xbf16>, vector<64x128xf32> -> vector<64x128xf32>
    %44 = arith.addf %40, %43 : vector<64x128xf32>
    %c0_44 = arith.constant 0 : index
    %c0_45 = arith.constant 0 : index
    %45 = vector.load %arg6[%c0_44, %c0_45] : memref<64x128xf32, #tpu.memory_space<vmem>>, vector<64x128xf32>
    tpu.vector_store %arg6[%c0_44, %c0_45], %44 {strides = array<i32>} : memref<64x128xf32, #tpu.memory_space<vmem>>, vector<64x128xf32>,
    %c3_46 = arith.constant 3 : index
    %c0_47 = arith.constant 0 : index
    %c0_48 = arith.constant 0 : index
    %c0_49 = arith.constant 0 : index
    %46 = vector.load %arg1[%c3_46, %c0_47, %c0_48, %c0_49] : memref<4x9x9x16xbf16, #tpu.memory_space<vmem>>, vector<1x8x8x16xbf16>
    %47 = vector.shape_cast %46 : vector<1x8x8x16xbf16> to vector<8x8x16xbf16>
    %48 = arith.extf %47 : vector<8x8x16xbf16> to vector<8x8x16xf32>
    %49 = vector.shape_cast %48 : vector<8x8x16xf32> to vector<64x16xf32>
    %50 = arith.truncf %49 : vector<64x16xf32> to vector<64x16xbf16>
    %c0_50 = arith.constant 0 : index
    %c0_51 = arith.constant 0 : index
    %51 = vector.load %arg6[%c0_50, %c0_51] : memref<64x128xf32, #tpu.memory_space<vmem>>, vector<64x128xf32>
    %c4 = arith.constant 4 : index
    %c0_52 = arith.constant 0 : index
    %c0_53 = arith.constant 0 : index
    %52 = vector.load %arg2[%c4, %c0_52, %c0_53] : memref<9x16x128xbf16, #tpu.memory_space<vmem>>, vector<1x16x128xbf16>
    %53 = vector.shape_cast %52 : vector<1x16x128xbf16> to vector<16x128xbf16>
    %cst_54 = arith.constant dense<0.000000e+00> : vector<64x128xf32>
    %54 = tpu.matmul %50, %53, %cst_54 {dimension_numbers = #tpu.dot_dimension_numbers<[1], [0], [0], [1], [0, 0, 1, 1], [], []>} : vector<64x16xbf16>, vector<16x128xbf16>, vector<64x128xf32> -> vector<64x128xf32>
    %55 = arith.addf %51, %54 : vector<64x128xf32>
    %c0_55 = arith.constant 0 : index
    %c0_56 = arith.constant 0 : index
    %56 = vector.load %arg6[%c0_55, %c0_56] : memref<64x128xf32, #tpu.memory_space<vmem>>, vector<64x128xf32>
    tpu.vector_store %arg6[%c0_55, %c0_56], %55 {strides = array<i32>} : memref<64x128xf32, #tpu.memory_space<vmem>>, vector<64x128xf32>,
    %c2_57 = arith.constant 2 : index
    %c0_58 = arith.constant 0 : index
    %c1_59 = arith.constant 1 : index
    %c0_60 = arith.constant 0 : index
    %57 = vector.load %arg1[%c2_57, %c0_58, %c1_59, %c0_60] : memref<4x9x9x16xbf16, #tpu.memory_space<vmem>>, vector<1x8x8x16xbf16>
    %58 = vector.shape_cast %57 : vector<1x8x8x16xbf16> to vector<8x8x16xbf16>
    %59 = arith.extf %58 : vector<8x8x16xbf16> to vector<8x8x16xf32>
    %60 = vector.shape_cast %59 : vector<8x8x16xf32> to vector<64x16xf32>
    %61 = arith.truncf %60 : vector<64x16xf32> to vector<64x16xbf16>
    %c0_61 = arith.constant 0 : index
    %c0_62 = arith.constant 0 : index
    %62 = vector.load %arg6[%c0_61, %c0_62] : memref<64x128xf32, #tpu.memory_space<vmem>>, vector<64x128xf32>
    %c5 = arith.constant 5 : index
    %c0_63 = arith.constant 0 : index
    %c0_64 = arith.constant 0 : index
    %63 = vector.load %arg2[%c5, %c0_63, %c0_64] : memref<9x16x128xbf16, #tpu.memory_space<vmem>>, vector<1x16x128xbf16>
    %64 = vector.shape_cast %63 : vector<1x16x128xbf16> to vector<16x128xbf16>
    %cst_65 = arith.constant dense<0.000000e+00> : vector<64x128xf32>
    %65 = tpu.matmul %61, %64, %cst_65 {dimension_numbers = #tpu.dot_dimension_numbers<[1], [0], [0], [1], [0, 0, 1, 1], [], []>} : vector<64x16xbf16>, vector<16x128xbf16>, vector<64x128xf32> -> vector<64x128xf32>
    %66 = arith.addf %62, %65 : vector<64x128xf32>
    %c0_66 = arith.constant 0 : index
    %c0_67 = arith.constant 0 : index
    %67 = vector.load %arg6[%c0_66, %c0_67] : memref<64x128xf32, #tpu.memory_space<vmem>>, vector<64x128xf32>
    tpu.vector_store %arg6[%c0_66, %c0_67], %66 {strides = array<i32>} : memref<64x128xf32, #tpu.memory_space<vmem>>, vector<64x128xf32>,
    %c0_68 = arith.constant 0 : index
    %c1_69 = arith.constant 1 : index
    %c0_70 = arith.constant 0 : index
    %c0_71 = arith.constant 0 : index
    %68 = vector.load %arg1[%c0_68, %c1_69, %c0_70, %c0_71] : memref<4x9x9x16xbf16, #tpu.memory_space<vmem>>, vector<1x8x8x16xbf16>
    %69 = vector.shape_cast %68 : vector<1x8x8x16xbf16> to vector<8x8x16xbf16>
    %70 = arith.extf %69 : vector<8x8x16xbf16> to vector<8x8x16xf32>
    %71 = vector.shape_cast %70 : vector<8x8x16xf32> to vector<64x16xf32>
    %72 = arith.truncf %71 : vector<64x16xf32> to vector<64x16xbf16>
    %c0_72 = arith.constant 0 : index
    %c0_73 = arith.constant 0 : index
    %73 = vector.load %arg6[%c0_72, %c0_73] : memref<64x128xf32, #tpu.memory_space<vmem>>, vector<64x128xf32>
    %c6 = arith.constant 6 : index
    %c0_74 = arith.constant 0 : index
    %c0_75 = arith.constant 0 : index
    %74 = vector.load %arg2[%c6, %c0_74, %c0_75] : memref<9x16x128xbf16, #tpu.memory_space<vmem>>, vector<1x16x128xbf16>
    %75 = vector.shape_cast %74 : vector<1x16x128xbf16> to vector<16x128xbf16>
    %cst_76 = arith.constant dense<0.000000e+00> : vector<64x128xf32>
    %76 = tpu.matmul %72, %75, %cst_76 {dimension_numbers = #tpu.dot_dimension_numbers<[1], [0], [0], [1], [0, 0, 1, 1], [], []>} : vector<64x16xbf16>, vector<16x128xbf16>, vector<64x128xf32> -> vector<64x128xf32>
    %77 = arith.addf %73, %76 : vector<64x128xf32>
    %c0_77 = arith.constant 0 : index
    %c0_78 = arith.constant 0 : index
    %78 = vector.load %arg6[%c0_77, %c0_78] : memref<64x128xf32, #tpu.memory_space<vmem>>, vector<64x128xf32>
    tpu.vector_store %arg6[%c0_77, %c0_78], %77 {strides = array<i32>} : memref<64x128xf32, #tpu.memory_space<vmem>>, vector<64x128xf32>,
    %c1_79 = arith.constant 1 : index
    %c1_80 = arith.constant 1 : index
    %c0_81 = arith.constant 0 : index
    %c0_82 = arith.constant 0 : index
    %79 = vector.load %arg1[%c1_79, %c1_80, %c0_81, %c0_82] : memref<4x9x9x16xbf16, #tpu.memory_space<vmem>>, vector<1x8x8x16xbf16>
    %80 = vector.shape_cast %79 : vector<1x8x8x16xbf16> to vector<8x8x16xbf16>
    %81 = arith.extf %80 : vector<8x8x16xbf16> to vector<8x8x16xf32>
    %82 = vector.shape_cast %81 : vector<8x8x16xf32> to vector<64x16xf32>
    %83 = arith.truncf %82 : vector<64x16xf32> to vector<64x16xbf16>
    %c0_83 = arith.constant 0 : index
    %c0_84 = arith.constant 0 : index
    %84 = vector.load %arg6[%c0_83, %c0_84] : memref<64x128xf32, #tpu.memory_space<vmem>>, vector<64x128xf32>
    %c7 = arith.constant 7 : index
    %c0_85 = arith.constant 0 : index
    %c0_86 = arith.constant 0 : index
    %85 = vector.load %arg2[%c7, %c0_85, %c0_86] : memref<9x16x128xbf16, #tpu.memory_space<vmem>>, vector<1x16x128xbf16>
    %86 = vector.shape_cast %85 : vector<1x16x128xbf16> to vector<16x128xbf16>
    %cst_87 = arith.constant dense<0.000000e+00> : vector<64x128xf32>
    %87 = tpu.matmul %83, %86, %cst_87 {dimension_numbers = #tpu.dot_dimension_numbers<[1], [0], [0], [1], [0, 0, 1, 1], [], []>} : vector<64x16xbf16>, vector<16x128xbf16>, vector<64x128xf32> -> vector<64x128xf32>
    %88 = arith.addf %84, %87 : vector<64x128xf32>
    %c0_88 = arith.constant 0 : index
    %c0_89 = arith.constant 0 : index
    %89 = vector.load %arg6[%c0_88, %c0_89] : memref<64x128xf32, #tpu.memory_space<vmem>>, vector<64x128xf32>
    tpu.vector_store %arg6[%c0_88, %c0_89], %88 {strides = array<i32>} : memref<64x128xf32, #tpu.memory_space<vmem>>, vector<64x128xf32>,
    %c0_90 = arith.constant 0 : index
    %c1_91 = arith.constant 1 : index
    %c1_92 = arith.constant 1 : index
    %c0_93 = arith.constant 0 : index
    %90 = vector.load %arg1[%c0_90, %c1_91, %c1_92, %c0_93] : memref<4x9x9x16xbf16, #tpu.memory_space<vmem>>, vector<1x8x8x16xbf16>
    %91 = vector.shape_cast %90 : vector<1x8x8x16xbf16> to vector<8x8x16xbf16>
    %92 = arith.extf %91 : vector<8x8x16xbf16> to vector<8x8x16xf32>
    %93 = vector.shape_cast %92 : vector<8x8x16xf32> to vector<64x16xf32>
    %94 = arith.truncf %93 : vector<64x16xf32> to vector<64x16xbf16>
    %c0_94 = arith.constant 0 : index
    %c0_95 = arith.constant 0 : index
    %95 = vector.load %arg6[%c0_94, %c0_95] : memref<64x128xf32, #tpu.memory_space<vmem>>, vector<64x128xf32>
    %c8 = arith.constant 8 : index
    %c0_96 = arith.constant 0 : index
    %c0_97 = arith.constant 0 : index
    %96 = vector.load %arg2[%c8, %c0_96, %c0_97] : memref<9x16x128xbf16, #tpu.memory_space<vmem>>, vector<1x16x128xbf16>
    %97 = vector.shape_cast %96 : vector<1x16x128xbf16> to vector<16x128xbf16>
    %cst_98 = arith.constant dense<0.000000e+00> : vector<64x128xf32>
    %98 = tpu.matmul %94, %97, %cst_98 {dimension_numbers = #tpu.dot_dimension_numbers<[1], [0], [0], [1], [0, 0, 1, 1], [], []>} : vector<64x16xbf16>, vector<16x128xbf16>, vector<64x128xf32> -> vector<64x128xf32>
    %99 = arith.addf %95, %98 : vector<64x128xf32>
    %c0_99 = arith.constant 0 : index
    %c0_100 = arith.constant 0 : index
    %100 = vector.load %arg6[%c0_99, %c0_100] : memref<64x128xf32, #tpu.memory_space<vmem>>, vector<64x128xf32>
    tpu.vector_store %arg6[%c0_99, %c0_100], %99 {strides = array<i32>} : memref<64x128xf32, #tpu.memory_space<vmem>>, vector<64x128xf32>,
    %c0_101 = arith.constant 0 : index
    %c0_102 = arith.constant 0 : index
    %101 = vector.load %arg6[%c0_101, %c0_102] : memref<64x128xf32, #tpu.memory_space<vmem>>, vector<64x128xf32>
    %102 = arith.truncf %101 : vector<64x128xf32> to vector<64x128xbf16>
    %c0_103 = arith.constant 0 : index
    %c0_104 = arith.constant 0 : index
    %c0_105 = arith.constant 0 : index
    %103 = vector.load %arg3[%c0_103, %c0_104, %c0_105] : memref<1x64x128xbf16, #tpu.memory_space<vmem>>, vector<1x64x128xbf16>
    %104 = vector.shape_cast %103 : vector<1x64x128xbf16> to vector<64x128xbf16>
    %105 = vector.shape_cast %102 : vector<64x128xbf16> to vector<1x64x128xbf16>
    tpu.vector_store %arg3[%c0_103, %c0_104, %c0_105], %105 {strides = array<i32>} : memref<1x64x128xbf16, #tpu.memory_space<vmem>>, vector<1x64x128xbf16>,
    %cst_106 = arith.constant dense<0.000000e+00> : vector<128xf32>
    %106 = vector.multi_reduction <add>, %101, %cst_106 [0] : vector<64x128xf32> to vector<128xf32>
    %107 = vector.shape_cast %106 : vector<128xf32> to vector<1x128xf32>
    %c0_107 = arith.constant 0 : index
    %c0_108 = arith.constant 0 : index
    %c0_109 = arith.constant 0 : index
    %108 = vector.load %arg4[%c0_107, %c0_108, %c0_109] : memref<1x1x128xf32, #tpu.memory_space<vmem>>, vector<1x1x128xf32>
    %109 = vector.shape_cast %108 : vector<1x1x128xf32> to vector<1x128xf32>
    %110 = vector.shape_cast %107 : vector<1x128xf32> to vector<1x1x128xf32>
    tpu.vector_store %arg4[%c0_107, %c0_108, %c0_109], %110 {strides = array<i32>} : memref<1x1x128xf32, #tpu.memory_space<vmem>>, vector<1x1x128xf32>,
    %111 = arith.mulf %101, %101 : vector<64x128xf32>
    %cst_110 = arith.constant dense<0.000000e+00> : vector<128xf32>
    %112 = vector.multi_reduction <add>, %111, %cst_110 [0] : vector<64x128xf32> to vector<128xf32>
    %113 = vector.shape_cast %112 : vector<128xf32> to vector<1x128xf32>
    %c0_111 = arith.constant 0 : index
    %c0_112 = arith.constant 0 : index
    %c0_113 = arith.constant 0 : index
    %114 = vector.load %arg5[%c0_111, %c0_112, %c0_113] : memref<1x1x128xf32, #tpu.memory_space<vmem>>, vector<1x1x128xf32>
    %115 = vector.shape_cast %114 : vector<1x1x128xf32> to vector<1x128xf32>
    %116 = vector.shape_cast %113 : vector<1x128xf32> to vector<1x1x128xf32>
    tpu.vector_store %arg5[%c0_111, %c0_112, %c0_113], %116 {strides = array<i32>} : memref<1x1x128xf32, #tpu.memory_space<vmem>>, vector<1x1x128xf32>,
    return
  }
  func.func @transform_0(%arg0: i32) -> (i32, i32, i32, i32) {
    %c0_i32 = arith.constant 0 : i32
    %c0_i32_0 = arith.constant 0 : i32
    %c0_i32_1 = arith.constant 0 : i32
    %c0_i32_2 = arith.constant 0 : i32
    return %arg0, %c0_i32, %c0_i32_0, %c0_i32_1 : i32, i32, i32, i32
  }
  func.func @transform_1(%arg0: i32) -> (i32, i32, i32) {
    %c0_i32 = arith.constant 0 : i32
    %c0_i32_0 = arith.constant 0 : i32
    %c0_i32_1 = arith.constant 0 : i32
    %c0_i32_2 = arith.constant 0 : i32
    return %c0_i32, %c0_i32_0, %c0_i32_1 : i32, i32, i32
  }
  func.func @transform_2(%arg0: i32) -> (i32, i32, i32) {
    %c0_i32 = arith.constant 0 : i32
    %c0_i32_0 = arith.constant 0 : i32
    %c0_i32_1 = arith.constant 0 : i32
    return %arg0, %c0_i32, %c0_i32_0 : i32, i32, i32
  }
  func.func @transform_3(%arg0: i32) -> (i32, i32, i32) {
    %c0_i32 = arith.constant 0 : i32
    %c0_i32_0 = arith.constant 0 : i32
    %c0_i32_1 = arith.constant 0 : i32
    return %arg0, %c0_i32, %c0_i32_0 : i32, i32, i32
  }
  func.func @transform_4(%arg0: i32) -> (i32, i32, i32) {
    %c0_i32 = arith.constant 0 : i32
    %c0_i32_0 = arith.constant 0 : i32
    %c0_i32_1 = arith.constant 0 : i32
    return %arg0, %c0_i32, %c0_i32_0 : i32, i32, i32
  }
}

</mosaic_0001>

<bundles_post_ra>
// kernel: tpu_custom_call.1
= control target key start
LH: loop header
LB: loop body
LE: loop exit
PB: predicated region body
PF: predicated region fallthrough
CT: control target
= control target key end

     0   :  { %10 = vsyncpa [#allocation4], 0  ;;  %s2413_s0 = inlined_call_operand.vmem [shape: bf16[8,9,9,16], index: 0, kind: input, shape index: {}]   ;;  %s2414_s1 = inlined_call_operand.vmem [shape: bf16[9,16,128], index: 1, kind: input, shape index: {}]   ;;  %s2415_s2 = inlined_call_operand.hbm [shape: bf16[2,64,128], index: 2, kind: output, shape index: {0}]   ;;  %s2416_s3 = inlined_call_operand.hbm [shape: f32[2,1,128], index: 3, kind: output, shape index: {1}]   ;;  %s2417_s4 = inlined_call_operand.hbm [shape: f32[2,1,128], index: 4, kind: output, shape index: {2}]  }
   0x1   :  { %12 = vsyncpa [#allocation4 + $0x1], 0 }
   0x2   :  { %13 = vsyncpa [#allocation6], 0 }
   0x3   :  { %15 = vsyncpa [#allocation6 + $0x1], 0  ;;  %s2026_s15 = smov 0   ;;  %s2028_s16 = smov 0  }
   0x4   :  { %s2030_s17 = smov 0   ;;  %s2032_s18 = smov 0  }
   0x5 LB: > { %s2047_s19 = sadd.s32 4294967295, %s1997_s18   ;;  %s1495_s20 = sadd.s32 4294967294, %s1997_s18   ;;  %s1997_s18 = sphi %s2032_s18, %s2423_s18   ;;  %s1993_s17 = sphi %s2030_s17, %s2422_s17   ;;  %s1989_s16 = sphi %s2028_s16, %s2421_s16   ;;  %s1985_s15 = sphi %s2026_s15, %s2420_s15  }
   0x6   : > { %s2051_s21 = sadd.s32 1, %s1997_s18   ;;  %s75_s22 = sadd.s32 1, %s1993_s17 }
   0x7   : > { %s72_s23 = ssub.s32 %s1997_s18, %s2051_s21  ;;  %p85_p0 = scmp.ne.s32.totalorder %s1993_s17, %s1989_s16 }
   0x8   : > { %p73_p1 = scmp.eq.s32.totalorder %s72_s23, 0  ;;  %p86_p2 = scmp.eq.s32.totalorder %s2047_s19, 1 }
   0x9   : > { %p91_p3 = scmp.ne.s32.totalorder %s1989_s16, %s1985_s15  ;;  %p92_p4 = scmp.eq.s32.totalorder %s1495_s20, 1 }
   0xa   : > { %s2064_s24 = scalar_select %p73_p1, %s1993_s17, %s75_s22  }
   0xb   : > { %p2066_p5 = por %p86_p2, %p85_p0  ;;  %p2070_p6 = por %p92_p4, %p91_p3 }
   0xc   : > { %p1498_p7 = scmp.ge.s32.totalorder %s1997_s18, 1  ;;  %p175_p8 = scmp.lt.s32.totalorder %s1997_s18, 3 }
   0xe   : > { %p176_p9 = pnand %p1498_p7, %p175_p8 }
   0xf   : > { %s1500_s29 = sshll.u32 (!%p176_p9), %s2047_s19, 2  ;;  %s2302_s8 = sand.u32 (!%p176_p9), 1, %s1989_s16  }
  0x10   : > { %179 = sbr.rel (%p176_p9) target bundleno = 338 (0x152), region = 28  ;;  %p211_p10 = scmp.lt.s32.totalorder (!%p176_p9), %s1500_s29, 7 }
  0x11   : > { %s1499_s9 = sshll.u32 (!%p176_p9), %s2302_s8, 5  ;;  %s1796_s11 = sshll.u32 (!%p176_p9), %s2047_s19, 5 }
  0x12   : > { %s2306_s10 = scalar_lea.vmem (!%p176_p9), [#allocation3], %s1499_s9  ;;  %s1350_s14 = scalar_lea.hbm (!%p176_p9), %s2415_s2, %s1796_s11 }
  0x13   : > { %s1353_s23 = sshll.u32 (!%p176_p9), %s1350_s14, 4  ;;  %s1331_s27 = scalar_lea.sflag (!%p176_p9), [#allocation4], %s2302_s8  ;;  %s1354_s23 = int_to_ptr.hbm [resolvable:$true] %s1353_s23 }
  0x14   : > { %s1889_s28 = sshra.s32 (!%p176_p9), %s1354_s23, 4  ;;  %s1895_s6 = scalar_lea.hbm (!%p176_p9), %s2415_s2, 64  ;;  %s1890_s28 = int_to_ptr.hbm [resolvable:$true] %s1889_s28 }
  0x15   : > { %v1767_v0 = vld [vmem:[%s2414_s1] sm:$0xff]  ;;  %v1773_v1 = vld [vmem:[%s2414_s1 + $0x10] sm:$0xff]  ;;  %v1778_v2 = vld [vmem:[%s2414_s1 + $0x18] sm:$0xff]  ;;  %s2425_s29 = smov (!%p211_p10, %s1500_s29), 7  ;;  %vm262_vm0 = vcmask 130048   ;;  %vm463_vm1 = vcmask 1046528   ;;  %p1896_p0 = scmp.lt.s32.totalorder %s1890_s28, %s2415_s2 }
  0x16   : > { %v1772_v3 = vld [vmem:[%s2414_s1 + $0x8] sm:$0xff]  ;;  %v1783_v4 = vld [vmem:[%s2414_s1 + $0x20] sm:$0xff]  ;;  %1820 = vmatpush.bf16.msra.mxu1 %v1767_v0  ;;  %1821 = vmatpush.bf16.msra.mxu2 %v1767_v0  ;;  %s1823_s12 = smul.u32 72, %s2425_s29  ;;  %v1789_v5 = vld [vmem:[%s2414_s1 + $0x30] sm:$0xff]  ;;  %s1891_s29 = scalar_lea.hbm %s1890_s28, 32 }
  0x17   : > { %1822 = vmatpush.bf16.msra.mxu3 %v1767_v0  ;;  %282 = vmatpush.bf16.msra.mxu0 %v1767_v0  ;;  %v1794_v9 = vld [vmem:[%s2414_s1 + $0x38] sm:$0xff]  ;;  %v1784_v18 = vld [vmem:[%s2414_s1 + $0x28] sm:$0xff]  ;;  %v1795_v22 = vld [vmem:[%s2414_s1 + $0x40] sm:$0xff]  ;;  %p1892_p11 = scmp.ne.s32.totalorder %s1890_s28, %s1891_s29  ;;  %p1897_p1 = scmp.lt.s32.totalorder %s1895_s6, %s1891_s29 }
  0x18   : > { %s2095_s22 = scalar_lea.vmem %s2413_s0, %s1823_s12 }
  0x19   : > { %v1508_v6 = vld [vmem:[%s2095_s22 + $0x10] sm:$0xf]  ;;  %v1764_v7 = vld [vmem:[%s2095_s22 + $0x14] sm:$0xf0]  ;;  %v1512_v8 = vld [vmem:[%s2095_s22 + $0x20] sm:$0xf]  ;;  %p1893_p12 = pnand %p1892_p11, %p2066_p5  ;;  %p1898_p2 = por %p1897_p1, %p1896_p0 }
  0x1a   : > { %536 = vmatpush.bf16.msrb.mxu2 %v1773_v1  ;;  %377 = vmatpush.bf16.msrb.mxu1 %v1772_v3  ;;  %v1509_v10 = vor.u32 %v1764_v7, %v1508_v6  ;;  %v1765_v11 = vld [vmem:[%s2095_s22 + $0x24] sm:$0xf0]  ;;  %v1516_v12 = vld [vmem:[%s2095_s22 + $0x30] sm:$0xf]  ;;  %v1766_v13 = vld [vmem:[%s2095_s22 + $0x34] sm:$0xf0] }
  0x1b   : > { %631 = vmatpush.bf16.msrb.mxu3 %v1778_v2  ;;  %726 = vmatpush.bf16.msrb.mxu0 %v1783_v4  ;;  %v1513_v14 = vor.u32 %v1765_v11, %v1512_v8  ;;  %v1517_v15 = vor.u32 %v1766_v13, %v1516_v12  ;;  %v1504_v16 = vld [vmem:[%s2095_s22] sm:$0xf]  ;;  %v1763_v17 = vld [vmem:[%s2095_s22 + $0x4] sm:$0xf0]  ;;  %v416_v21 = vld [vmem:[%s2095_s22 + $0x4] sm:$0x1]  ;;  %p1894_p13 = pneg %p1893_p12 }
  0x1c   : > { %1523 = vmatmul.msk.bf16.vlgmr.msra.gmra.mxu1 %vm262_vm0, %v1509_v10  ;;  %v1505_v19 = vor.u32 %v1763_v17, %v1504_v16  ;;  %v415_v20 = vld [vmem:[%s2095_s22] sm:$0xf]  ;;  %v417_v23 = vld [vmem:[%s2095_s22 + $0x8] sm:$0xf]  ;;  %v418_v24 = vld [vmem:[%s2095_s22 + $0xc] sm:$0x1]  ;;  %v432_v26 = vunpack.c.l.bf16 %v416_v21 }
  0x1d   : > { %1524 = vmatmul.msk.bf16.vlgmr.msra.gmra.mxu2 %vm262_vm0, %v1513_v14  ;;  %1525 = vmatmul.msk.bf16.vlgmr.msra.gmra.mxu3 %vm262_vm0, %v1517_v15  ;;  %v431_v25 = vunpack.c.l.bf16 %v415_v20  ;;  %v433_v27 = vunpack.c.l.bf16 %v417_v23  ;;  %v434_v28 = vunpack.c.l.bf16 %v418_v24  ;;  %v1536_v33 = vld [vmem:[%s2095_s22 + $0x48] sm:$0xf]  ;;  %v1768_v34 = vld [vmem:[%s2095_s22 + $0x4c] sm:$0xf0]  ;;  %v1774_v38 = vld [vmem:[%s2095_s22 + $0x94] sm:$0xf0]  ;;  %p1899_p3 = pnand %p1898_p2, %p1894_p13 }
  0x1e   : > { %1522 = vmatmul.msk.bf16.vlgmr.msra.gmra.mxu0 %vm262_vm0, %v1505_v19  ;;  %979 = vmatpush.bf16.msra.mxu2 %v1789_v5  ;;  %v465_v30 = vrot.slane %v432_v26, 1  ;;  %v1580_v37 = vld [vmem:[%s2095_s22 + $0x90] sm:$0xf]  ;;  %v1614_v39 = vld [vmem:[%s2095_s22 + $0xd8] sm:$0xf]  ;;  %v1537_v41 = vor.u32 %v1768_v34, %v1536_v33 }
  0x1f   : > { %1074 = vmatpush.bf16.msra.mxu3 %v1794_v9  ;;  %884 = vmatpush.bf16.msra.mxu1 %v1784_v18  ;;  %v464_v29 = vrot.slane %v431_v25, 1  ;;  %v467_v31 = vrot.slane %v433_v27, 1  ;;  %v468_v32 = vrot.slane %v434_v28, 1  ;;  %v1779_v40 = vld [vmem:[%s2095_s22 + $0xdc] sm:$0xf0]  ;;  %v1581_v43 = vor.u32 %v1774_v38, %v1580_v37 }
  0x20   : > { %1232 = vmatpush.bf16.msra.mxu0 %v1795_v22  ;;  %v1615_v44 = vor.u32 %v1779_v40, %v1614_v39  ;;  %v419_v45 = vld [vmem:[%s2095_s22 + $0x10] sm:$0xf]  ;;  %v420_v46 = vld [vmem:[%s2095_s22 + $0x14] sm:$0x1]  ;;  %v421_v47 = vld [vmem:[%s2095_s22 + $0x18] sm:$0xf] }
  0x21   : > { %v466_v35 = vsel %vm463_vm1, %v464_v29, %v465_v30  ;;  %v469_v36 = vsel %vm463_vm1, %v467_v31, %v468_v32  ;;  %v422_v48 = vld [vmem:[%s2095_s22 + $0x1c] sm:$0x1]  ;;  %v435_v49 = vunpack.c.l.bf16 %v419_v45  ;;  %v436_v50 = vunpack.c.l.bf16 %v420_v46  ;;  %v1540_v57 = vld [vmem:[%s2095_s22 + $0x58] sm:$0xf]  ;;  %v1769_v58 = vld [vmem:[%s2095_s22 + $0x5c] sm:$0xf0] }
  0x22   : > { %v496_v42 = vpack.c.bf16 %v469_v36, %v466_v35  ;;  %v437_v51 = vunpack.c.l.bf16 %v421_v47  ;;  %v438_v52 = vunpack.c.l.bf16 %v422_v48  ;;  %v1584_v61 = vld [vmem:[%s2095_s22 + $0xa0] sm:$0xf]  ;;  %v1775_v62 = vld [vmem:[%s2095_s22 + $0xa4] sm:$0xf0]  ;;  %v1780_v0 = vld [vmem:[%s2095_s22 + $0xec] sm:$0xf0]  ;;  %v1541_v1 = vor.u32 %v1769_v58, %v1540_v57 }
  0x23   : > { %v470_v53 = vrot.slane %v435_v49, 1  ;;  %v471_v54 = vrot.slane %v436_v50, 1  ;;  %v1618_v63 = vld [vmem:[%s2095_s22 + $0xe8] sm:$0xf]  ;;  %v1585_v3 = vor.u32 %v1775_v62, %v1584_v61  ;;  %v423_v5 = vld [vmem:[%s2095_s22 + $0x20] sm:$0xf] }
  0x24   : > { %v473_v55 = vrot.slane %v437_v51, 1  ;;  %v474_v56 = vrot.slane %v438_v52, 1  ;;  %v1619_v4 = vor.u32 %v1780_v0, %v1618_v63  ;;  %v424_v6 = vld [vmem:[%s2095_s22 + $0x24] sm:$0x1]  ;;  %v425_v7 = vld [vmem:[%s2095_s22 + $0x28] sm:$0xf]  ;;  %v439_v9 = vunpack.c.l.bf16 %v423_v5 }
  0x25   : > { %v472_v59 = vsel %vm463_vm1, %v470_v53, %v471_v54  ;;  %v426_v8 = vld [vmem:[%s2095_s22 + $0x2c] sm:$0x1]  ;;  %v440_v10 = vunpack.c.l.bf16 %v424_v6  ;;  %v441_v11 = vunpack.c.l.bf16 %v425_v7  ;;  %v1544_v17 = vld [vmem:[%s2095_s22 + $0x68] sm:$0xf]  ;;  %v1770_v18 = vld [vmem:[%s2095_s22 + $0x6c] sm:$0xf0] }
  0x26   : > { %v475_v60 = vsel %vm463_vm1, %v473_v55, %v474_v56  ;;  %v442_v12 = vunpack.c.l.bf16 %v426_v8  ;;  %v476_v13 = vrot.slane %v439_v9, 1  ;;  %v1588_v21 = vld [vmem:[%s2095_s22 + $0xb0] sm:$0xf]  ;;  %v1776_v22 = vld [vmem:[%s2095_s22 + $0xb4] sm:$0xf0]  ;;  %v1545_v25 = vor.u32 %v1770_v18, %v1544_v17 }
  0x27   : > { %v497_v2 = vpack.c.bf16 %v475_v60, %v472_v59  ;;  %v477_v14 = vrot.slane %v440_v10, 1  ;;  %v479_v15 = vrot.slane %v441_v11, 1  ;;  %v1622_v23 = vld [vmem:[%s2095_s22 + $0xf8] sm:$0xf]  ;;  %v1781_v24 = vld [vmem:[%s2095_s22 + $0xfc] sm:$0xf0]  ;;  %v1589_v27 = vor.u32 %v1776_v22, %v1588_v21 }
  0x28   : > { %v480_v16 = vrot.slane %v442_v12, 1  ;;  %v1623_v28 = vor.u32 %v1781_v24, %v1622_v23  ;;  %v427_v29 = vld [vmem:[%s2095_s22 + $0x30] sm:$0xf]  ;;  %v428_v30 = vld [vmem:[%s2095_s22 + $0x34] sm:$0x1] }
  0x29   : > { %v478_v19 = vsel %vm463_vm1, %v476_v13, %v477_v14  ;;  %v429_v31 = vld [vmem:[%s2095_s22 + $0x38] sm:$0xf]  ;;  %v430_v32 = vld [vmem:[%s2095_s22 + $0x3c] sm:$0x1]  ;;  %v443_v33 = vunpack.c.l.bf16 %v427_v29  ;;  %v444_v34 = vunpack.c.l.bf16 %v428_v30  ;;  %v1592_v45 = vld [vmem:[%s2095_s22 + $0xc0] sm:$0xf] }
  0x2a   : > { %v481_v20 = vsel %vm463_vm1, %v479_v15, %v480_v16  ;;  %v445_v35 = vunpack.c.l.bf16 %v429_v31  ;;  %v446_v36 = vunpack.c.l.bf16 %v430_v32  ;;  %v1777_v46 = vld [vmem:[%s2095_s22 + $0xc4] sm:$0xf0]  ;;  %v1782_v48 = vld [vmem:[%s2095_s22 + $0x10c] sm:$0xf0]  ;;  %v1639_v54 = vld [vmem:[%s2095_s22 + $0x94] sm:$0x1] }
  0x2b   : > { %v498_v26 = vpack.c.bf16 %v481_v20, %v478_v19  ;;  %v482_v37 = vrot.slane %v443_v33, 1  ;;  %v483_v38 = vrot.slane %v444_v34, 1  ;;  %v1626_v47 = vld [vmem:[%s2095_s22 + $0x108] sm:$0xf]  ;;  %v1593_v51 = vor.u32 %v1777_v46, %v1592_v45  ;;  %v1638_v52 = vld [vmem:[%s2095_s22 + $0x90] sm:$0xf] }
  0x2c   : > { %1556 = vmatmul.msk.bf16.vlgmr.msrb.gmra.mxu1 %vm262_vm0, %v1537_v41  ;;  %v485_v39 = vrot.slane %v445_v35, 1  ;;  %v486_v40 = vrot.slane %v446_v36, 1  ;;  %v1548_v41 = vld [vmem:[%s2095_s22 + $0x78] sm:$0xf]  ;;  %v1627_v53 = vor.u32 %v1782_v48, %v1626_v47  ;;  %v1641_v56 = vld [vmem:[%s2095_s22 + $0x9c] sm:$0x1]  ;;  %v780_v61 = vunpack.c.l.bf16 %v1638_v52 }
  0x2d   : > { %1566 = vmatmul.msk.bf16.vlgmr.msrb.gmra.mxu2 %vm262_vm0, %v496_v42  ;;  %1600 = vmatmul.msk.bf16.vlgmr.msrb.gmra.mxu3 %vm262_vm0, %v1581_v43  ;;  %v1771_v42 = vld [vmem:[%s2095_s22 + $0x7c] sm:$0xf0]  ;;  %v484_v43 = vsel %vm463_vm1, %v482_v37, %v483_v38  ;;  %v1640_v55 = vld [vmem:[%s2095_s22 + $0x98] sm:$0xf]  ;;  %v1732_v57 = vld [vmem:[%s2095_s22 + $0x8] sm:$0xf]  ;;  %v781_v62 = vunpack.c.l.bf16 %v1639_v54  ;;  %v783_v0 = vunpack.c.l.bf16 %v1641_v56 }
  0x2e   : > { %1634 = vmatmul.msk.bf16.vlgmr.msrb.gmra.mxu0 %vm262_vm0, %v1615_v44  ;;  %v487_v44 = vsel %vm463_vm1, %v485_v39, %v486_v40  ;;  %v1549_v49 = vor.u32 %v1771_v42, %v1548_v41  ;;  %v1733_v58 = vld [vmem:[%s2095_s22 + $0xc] sm:$0x1]  ;;  %v1734_v59 = vld [vmem:[%s2095_s22 + $0x10] sm:$0xf]  ;;  %v1735_v60 = vld [vmem:[%s2095_s22 + $0x14] sm:$0x1]  ;;  %v782_v63 = vunpack.c.l.bf16 %v1640_v55 }
  0x2f   : > { %v499_v50 = vpack.c.bf16 %v487_v44, %v484_v43  ;;  %v812_v5 = vrot.slane %v780_v61, 1  ;;  %v813_v6 = vrot.slane %v781_v62, 1  ;;  %v816_v8 = vrot.slane %v783_v0, 1  ;;  %v1674_v15 = vld [vmem:[%s2095_s22 + $0x8] sm:$0xf] }
  0x30   : > { %v815_v7 = vrot.slane %v782_v63, 1  ;;  %v1785_v16 = vld [vmem:[%s2095_s22 + $0xc] sm:$0xf0]  ;;  %v1790_v18 = vld [vmem:[%s2095_s22 + $0x54] sm:$0xf0] }
  0x31   : > { %v814_v13 = vsel %vm463_vm1, %v812_v5, %v813_v6  ;;  %v1708_v17 = vld [vmem:[%s2095_s22 + $0x50] sm:$0xf]  ;;  %v1675_v22 = vor.u32 %v1785_v16, %v1674_v15  ;;  %v1642_v24 = vld [vmem:[%s2095_s22 + $0xa0] sm:$0xf]  ;;  %v1736_v29 = vld [vmem:[%s2095_s22 + $0x18] sm:$0xf] }
  0x32   : > { %v817_v14 = vsel %vm463_vm1, %v815_v7, %v816_v8  ;;  %v1709_v23 = vor.u32 %v1790_v18, %v1708_v17  ;;  %v1737_v30 = vld [vmem:[%s2095_s22 + $0x1c] sm:$0x1]  ;;  %v1738_v31 = vld [vmem:[%s2095_s22 + $0x20] sm:$0xf]  ;;  %v1739_v32 = vld [vmem:[%s2095_s22 + $0x24] sm:$0x1]  ;;  %v784_v33 = vunpack.c.l.bf16 %v1642_v24  ;;  %v1132_v37 = vunpack.c.l.bf16 %v1736_v29 }
  0x33   : > { %v844_v21 = vpack.c.bf16 %v817_v14, %v814_v13  ;;  %v1133_v38 = vunpack.c.l.bf16 %v1737_v30  ;;  %v1134_v39 = vunpack.c.l.bf16 %v1738_v31  ;;  %v1135_v40 = vunpack.c.l.bf16 %v1739_v32  ;;  %v1786_v52 = vld [vmem:[%s2095_s22 + $0x1c] sm:$0xf0]  ;;  %v1791_v54 = vld [vmem:[%s2095_s22 + $0x64] sm:$0xf0]  ;;  %v1647_v62 = vld [vmem:[%s2095_s22 + $0xb4] sm:$0x1] }
  0x34   : > { %v818_v41 = vrot.slane %v784_v33, 1  ;;  %v1166_v45 = vrot.slane %v1132_v37, 1  ;;  %v1648_v63 = vld [vmem:[%s2095_s22 + $0xb8] sm:$0xf]  ;;  %v1649_v0 = vld [vmem:[%s2095_s22 + $0xbc] sm:$0x1]  ;;  %v789_v6 = vunpack.c.l.bf16 %v1647_v62 }
  0x35   : > { %v1167_v46 = vrot.slane %v1133_v38, 1  ;;  %v1169_v47 = vrot.slane %v1134_v39, 1  ;;  %v1170_v48 = vrot.slane %v1135_v40, 1  ;;  %v790_v7 = vunpack.c.l.bf16 %v1648_v63  ;;  %v1787_v24 = vld [vmem:[%s2095_s22 + $0x2c] sm:$0xf0] }
  0x36   : > { %v791_v8 = vunpack.c.l.bf16 %v1649_v0  ;;  %v825_v14 = vrot.slane %v789_v6, 1  ;;  %v1650_v32 = vld [vmem:[%s2095_s22 + $0xc0] sm:$0xf]  ;;  %v1744_v37 = vld [vmem:[%s2095_s22 + $0x38] sm:$0xf] }
  0x37   : > { %v1168_v55 = vsel %vm463_vm1, %v1166_v45, %v1167_v46  ;;  %v1171_v56 = vsel %vm463_vm1, %v1169_v47, %v1170_v48  ;;  %v827_v15 = vrot.slane %v790_v7, 1  ;;  %v1745_v38 = vld [vmem:[%s2095_s22 + $0x3c] sm:$0x1]  ;;  %v1746_v39 = vld [vmem:[%s2095_s22 + $0x40] sm:$0xf]  ;;  %v1140_v45 = vunpack.c.l.bf16 %v1744_v37 }
  0x38   : > { %v1193_v61 = vpack.c.bf16 %v1171_v56, %v1168_v55  ;;  %v828_v16 = vrot.slane %v791_v8, 1  ;;  %v1747_v40 = vld [vmem:[%s2095_s22 + $0x44] sm:$0x1]  ;;  %v1141_v46 = vunpack.c.l.bf16 %v1745_v38  ;;  %v1142_v47 = vunpack.c.l.bf16 %v1746_v39  ;;  %v1793_v62 = vld [vmem:[%s2095_s22 + $0x84] sm:$0xf0] }
  0x39   : > { %v1143_v48 = vunpack.c.l.bf16 %v1747_v40 }
  0x3a   : > { %v1181_v55 = vrot.slane %v1142_v47, 1 }
  0x3b   : > { %v1182_v56 = vrot.slane %v1143_v48, 1 }
  0x3c   : > { %1557 = vmatmul.msk.bf16.gmra.mxu1 %vm262_vm0, %v1541_v1  ;;  %v1128_v1 = vunpack.c.l.bf16 %v1732_v57 }
  0x3d   : > { %1567 = vmatmul.msk.bf16.gmra.mxu2 %vm262_vm0, %v497_v2  ;;  %1601 = vmatmul.msk.bf16.gmra.mxu3 %vm262_vm0, %v1585_v3  ;;  %v1129_v2 = vunpack.c.l.bf16 %v1733_v58  ;;  %v1130_v3 = vunpack.c.l.bf16 %v1734_v59  ;;  %v1183_v0 = vsel %vm463_vm1, %v1181_v55, %v1182_v56 }
  0x3e   : > { %1635 = vmatmul.msk.bf16.gmra.mxu0 %vm262_vm0, %v1619_v4  ;;  %v1131_v4 = vunpack.c.l.bf16 %v1735_v60  ;;  %v1160_v9 = vrot.slane %v1128_v1, 1  ;;  %v1646_v60 = vld [vmem:[%s2095_s22 + $0xb0] sm:$0xf]  ;;  %v1740_v1 = vld [vmem:[%s2095_s22 + $0x28] sm:$0xf] }
  0x3f   : > { %v1161_v10 = vrot.slane %v1129_v2, 1  ;;  %v1163_v11 = vrot.slane %v1130_v3, 1  ;;  %v1741_v2 = vld [vmem:[%s2095_s22 + $0x2c] sm:$0x1]  ;;  %v1742_v3 = vld [vmem:[%s2095_s22 + $0x30] sm:$0xf]  ;;  %v788_v5 = vunpack.c.l.bf16 %v1646_v60 }
  0x40   : > { %v1164_v12 = vrot.slane %v1131_v4, 1  ;;  %v1743_v4 = vld [vmem:[%s2095_s22 + $0x34] sm:$0x1]  ;;  %v1788_v60 = vld [vmem:[%s2095_s22 + $0x3c] sm:$0xf0] }
  0x41   : > { %v1162_v19 = vsel %vm463_vm1, %v1160_v9, %v1161_v10  ;;  %v1136_v9 = vunpack.c.l.bf16 %v1740_v1  ;;  %v1137_v10 = vunpack.c.l.bf16 %v1741_v2  ;;  %v824_v13 = vrot.slane %v788_v5, 1 }
  0x42   : > { %v1165_v20 = vsel %vm463_vm1, %v1163_v11, %v1164_v12  ;;  %v1138_v11 = vunpack.c.l.bf16 %v1742_v3  ;;  %v1139_v12 = vunpack.c.l.bf16 %v1743_v4 }
  0x43   : > { %v1172_v17 = vrot.slane %v1136_v9, 1  ;;  %v1173_v18 = vrot.slane %v1137_v10, 1 }
  0x4c   : > { %1558 = vmatmul.msk.bf16.gmra.mxu1 %vm262_vm0, %v1545_v25  ;;  %v1192_v25 = vpack.c.bf16 %v1165_v20, %v1162_v19  ;;  %v1175_v19 = vrot.slane %v1138_v11, 1  ;;  %v1176_v20 = vrot.slane %v1139_v12, 1 }
  0x4d   : > { %1568 = vmatmul.msk.bf16.gmra.mxu2 %vm262_vm0, %v498_v26  ;;  %1602 = vmatmul.msk.bf16.gmra.mxu3 %vm262_vm0, %v1589_v27  ;;  %v1643_v26 = vld [vmem:[%s2095_s22 + $0xa4] sm:$0x1]  ;;  %v1644_v27 = vld [vmem:[%s2095_s22 + $0xa8] sm:$0xf] }
  0x4e   : > { %1636 = vmatmul.msk.bf16.gmra.mxu0 %vm262_vm0, %v1623_v28  ;;  %v1645_v28 = vld [vmem:[%s2095_s22 + $0xac] sm:$0x1]  ;;  %v785_v34 = vunpack.c.l.bf16 %v1643_v26  ;;  %v786_v35 = vunpack.c.l.bf16 %v1644_v27  ;;  %v1792_v26 = vld [vmem:[%s2095_s22 + $0x74] sm:$0xf0]  ;;  %v1174_v27 = vsel %vm463_vm1, %v1172_v17, %v1173_v18 }
  0x4f   : > { %v787_v36 = vunpack.c.l.bf16 %v1645_v28  ;;  %v1177_v28 = vsel %vm463_vm1, %v1175_v19, %v1176_v20 }
  0x50   : > { %v819_v42 = vrot.slane %v785_v34, 1  ;;  %v821_v43 = vrot.slane %v786_v35, 1  ;;  %v1194_v33 = vpack.c.bf16 %v1177_v28, %v1174_v27  ;;  %v1651_v34 = vld [vmem:[%s2095_s22 + $0xc4] sm:$0x1]  ;;  %v1652_v35 = vld [vmem:[%s2095_s22 + $0xc8] sm:$0xf] }
  0x51   : > { %v822_v44 = vrot.slane %v787_v36, 1  ;;  %v1653_v36 = vld [vmem:[%s2095_s22 + $0xcc] sm:$0x1] }
  0x5c   : > { %1559 = vmatmul.msk.bf16.gmra.mxu1 %vm262_vm0, %v1549_v49  ;;  %v820_v49 = vsel %vm463_vm1, %v818_v41, %v819_v42  ;;  %v792_v41 = vunpack.c.l.bf16 %v1650_v32  ;;  %v793_v42 = vunpack.c.l.bf16 %v1651_v34 }
  0x5d   : > { %1569 = vmatmul.msk.bf16.gmra.mxu2 %vm262_vm0, %v499_v50  ;;  %1603 = vmatmul.msk.bf16.gmra.mxu3 %vm262_vm0, %v1593_v51  ;;  %v823_v50 = vsel %vm463_vm1, %v821_v43, %v822_v44  ;;  %v1678_v51 = vld [vmem:[%s2095_s22 + $0x18] sm:$0xf]  ;;  %v794_v43 = vunpack.c.l.bf16 %v1652_v35  ;;  %v795_v44 = vunpack.c.l.bf16 %v1653_v36 }
  0x5e   : > { %1637 = vmatmul.msk.bf16.gmra.mxu0 %vm262_vm0, %v1627_v53  ;;  %v1712_v53 = vld [vmem:[%s2095_s22 + $0x60] sm:$0xf]  ;;  %v845_v57 = vpack.c.bf16 %v823_v50, %v820_v49  ;;  %v1679_v58 = vor.u32 %v1786_v52, %v1678_v51  ;;  %v830_v49 = vrot.slane %v792_v41, 1  ;;  %v831_v50 = vrot.slane %v793_v42, 1 }
  0x5f   : > { %v1713_v59 = vor.u32 %v1791_v54, %v1712_v53  ;;  %v833_v51 = vrot.slane %v794_v43, 1  ;;  %v834_v52 = vrot.slane %v795_v44, 1  ;;  %v1178_v53 = vrot.slane %v1140_v45, 1 }
  0x60   : > { %v1179_v54 = vrot.slane %v1141_v46, 1 }
  0x62   : > { %v1180_v63 = vsel %vm463_vm1, %v1178_v53, %v1179_v54 }
  0x63   : > { %v1195_v5 = vpack.c.bf16 %v1183_v0, %v1180_v63 }
  0x6c   : > { %1660 = vmatmul.msk.bf16.vlgmr.msra.gmra.mxu1 %vm262_vm0, %v844_v21  ;;  %v826_v21 = vsel %vm463_vm1, %v824_v13, %v825_v14 }
  0x6d   : > { %1694 = vmatmul.msk.bf16.vlgmr.msra.gmra.mxu2 %vm262_vm0, %v1675_v22  ;;  %1728 = vmatmul.msk.bf16.vlgmr.msra.gmra.mxu3 %vm262_vm0, %v1709_v23  ;;  %v829_v22 = vsel %vm463_vm1, %v827_v15, %v828_v16  ;;  %v1682_v23 = vld [vmem:[%s2095_s22 + $0x28] sm:$0xf] }
  0x6e   : > { %1754 = vmatmul.msk.bf16.vlgmr.msra.gmra.mxu0 %vm262_vm0, %v1192_v25  ;;  %v1716_v25 = vld [vmem:[%s2095_s22 + $0x70] sm:$0xf]  ;;  %v846_v29 = vpack.c.bf16 %v829_v22, %v826_v21  ;;  %v1683_v30 = vor.u32 %v1787_v24, %v1682_v23 }
  0x6f   : > { %v1717_v31 = vor.u32 %v1792_v26, %v1716_v25 }
  0x7c   : > { %1661 = vmatmul.msk.bf16.gmra.mxu1 %vm262_vm0, %v845_v57  ;;  %v832_v57 = vsel %vm463_vm1, %v830_v49, %v831_v50 }
  0x7d   : > { %1695 = vmatmul.msk.bf16.gmra.mxu2 %vm262_vm0, %v1679_v58  ;;  %1729 = vmatmul.msk.bf16.gmra.mxu3 %vm262_vm0, %v1713_v59  ;;  %v835_v58 = vsel %vm463_vm1, %v833_v51, %v834_v52  ;;  %v1686_v59 = vld [vmem:[%s2095_s22 + $0x38] sm:$0xf] }
  0x7e   : > { %1755 = vmatmul.msk.bf16.gmra.mxu0 %vm262_vm0, %v1193_v61  ;;  %v1720_v61 = vld [vmem:[%s2095_s22 + $0x80] sm:$0xf]  ;;  %v847_v1 = vpack.c.bf16 %v835_v58, %v832_v57  ;;  %v1687_v3 = vor.u32 %v1788_v60, %v1686_v59  ;;  %s1351_s22 = sshll.u32 %s2306_s10, 4  ;;  %s1352_s22 = int_to_ptr.vmem [resolvable:$true] %s1351_s22 }
  0x7f   : > { %v1721_v4 = vor.u32 %v1793_v62, %v1720_v61 }
  0x8c   : > { %1662 = vmatmul.msk.bf16.gmra.mxu1 %vm262_vm0, %v846_v29 }
  0x8d   : > { %1696 = vmatmul.msk.bf16.gmra.mxu2 %vm262_vm0, %v1683_v30  ;;  %1730 = vmatmul.msk.bf16.gmra.mxu3 %vm262_vm0, %v1717_v31 }
  0x8e   : > { %1756 = vmatmul.msk.bf16.gmra.mxu0 %vm262_vm0, %v1194_v33 }
  0x99   : > { %v289_v2 = vpop.f32.mrf.mxu1 }
  0x9b   : > { %v284_v6 = vpop.f32.mrf.mxu0 }
  0x9c   : > { %1663 = vmatmul.msk.bf16.gmra.mxu1 %vm262_vm0, %v847_v1 }
  0x9d   : > { %1697 = vmatmul.msk.bf16.gmra.mxu2 %vm262_vm0, %v1687_v3  ;;  %1731 = vmatmul.msk.bf16.gmra.mxu3 %vm262_vm0, %v1721_v4 }
  0x9e   : > { %1757 = vmatmul.msk.bf16.gmra.mxu0 %vm262_vm0, %v1195_v5 }
  0xa0   : > { %v294_v7 = vpop.f32.mrf.mxu2  ;;  %v2265_v8 = vpop.f32.mrf.mxu3 }
  0xa1   : > { %v2267_v9 = vpop.f32.mrf.mxu1 }
  0xa3   : > { %v286_v10 = vpop.f32.mrf.mxu0 }
  0xa8   : > { %v2269_v11 = vpop.f32.mrf.mxu2  ;;  %v2271_v12 = vpop.f32.mrf.mxu3 }
  0xa9   : > { %v379_v13 = vpop.f32.mrf.mxu1 }
  0xaa   : > { %v399_v14 = vadd.f32 %v379_v13, %v284_v6 }
  0xab   : > { %v728_v15 = vpop.f32.mrf.mxu0 }
  0xb0   : > { %v538_v16 = vpop.f32.mrf.mxu2  ;;  %v633_v17 = vpop.f32.mrf.mxu3 }
  0xb1   : > { %v558_v18 = vadd.f32 %v538_v16, %v399_v14  ;;  %v381_v19 = vpop.f32.mrf.mxu1 }
  0xb2   : > { %v400_v58 = vadd.f32 %v381_v19, %v286_v10 }
  0xb3   : > { %v653_v20 = vadd.f32 %v633_v17, %v558_v18  ;;  %v730_v21 = vpop.f32.mrf.mxu0 }
  0xb5   : > { %v748_v22 = vadd.f32 %v728_v15, %v653_v20 }
  0xb8   : > { %v540_v23 = vpop.f32.mrf.mxu2  ;;  %v635_v24 = vpop.f32.mrf.mxu3 }
  0xb9   : > { %v384_v25 = vpop.f32.mrf.mxu1  ;;  %v559_v60 = vadd.f32 %v540_v23, %v400_v58 }
  0xba   : > { %v401_v26 = vadd.f32 %v384_v25, %v289_v2 }
  0xbb   : > { %v733_v27 = vpop.f32.mrf.mxu0  ;;  %v654_v0 = vadd.f32 %v635_v24, %v559_v60 }
  0xbd   : > { %v749_v4 = vadd.f32 %v730_v21, %v654_v0 }
  0xc0   : > { %v543_v28 = vpop.f32.mrf.mxu2  ;;  %v638_v29 = vpop.f32.mrf.mxu3 }
  0xc1   : > { %v560_v30 = vadd.f32 %v543_v28, %v401_v26  ;;  %v386_v31 = vpop.f32.mrf.mxu1 }
  0xc2   : > { %v402_v16 = vadd.f32 %v386_v31, %v2267_v9 }
  0xc3   : > { %v655_v32 = vadd.f32 %v638_v29, %v560_v30  ;;  %v2273_v33 = vpop.f32.mrf.mxu0 }
  0xc5   : > { %v750_v34 = vadd.f32 %v733_v27, %v655_v32 }
  0xc8   : > { %v545_v35 = vpop.f32.mrf.mxu2  ;;  %v640_v36 = vpop.f32.mrf.mxu3 }
  0xc9   : > { %v389_v37 = vpop.f32.mrf.mxu1  ;;  %v561_v19 = vadd.f32 %v545_v35, %v402_v16 }
  0xca   : > { %v403_v38 = vadd.f32 %v389_v37, %v294_v7 }
  0xcb   : > { %v738_v39 = vpop.f32.mrf.mxu0  ;;  %v656_v28 = vadd.f32 %v640_v36, %v561_v19 }
  0xcd   : > { %v751_v35 = vadd.f32 %v2273_v33, %v656_v28 }
  0xd0   : > { %v548_v40 = vpop.f32.mrf.mxu2  ;;  %v643_v41 = vpop.f32.mrf.mxu3 }
  0xd1   : > { %v562_v42 = vadd.f32 %v548_v40, %v403_v38  ;;  %v2275_v43 = vpop.f32.mrf.mxu1 }
  0xd3   : > { %v657_v44 = vadd.f32 %v643_v41, %v562_v42  ;;  %v2277_v45 = vpop.f32.mrf.mxu0 }
  0xd5   : > { %v2279_v46 = vadd.f32 %v738_v39, %v657_v44 }
  0xd8   : > { %v2281_v47 = vpop.f32.mrf.mxu2  ;;  %v2283_v48 = vpop.f32.mrf.mxu3 }
  0xd9   : > { %v2285_v49 = vpop.f32.mrf.mxu1 }
  0xdb   : > { %v2287_v50 = vpop.f32.mrf.mxu0 }
  0xe0   : > { %v2289_v51 = vpop.f32.mrf.mxu2  ;;  %v2291_v52 = vpop.f32.mrf.mxu3 }
  0xe1   : > { %v2293_v53 = vpop.f32.mrf.mxu1 }
  0xe3   : > { %v2295_v54 = vpop.f32.mrf.mxu0 }
  0xe8   : > { %v2297_v55 = vpop.f32.mrf.mxu2  ;;  %v2299_v56 = vpop.f32.mrf.mxu3 }
  0xe9   : > { %v886_v57 = vpop.f32.mrf.mxu1 }
  0xea   : > { %v906_v61 = vadd.f32 %v886_v57, %v748_v22  ;;  %v404_v57 = vadd.f32 %v2275_v43, %v2269_v11  ;;  %v405_v11 = vadd.f32 %v2285_v49, %v2265_v8  ;;  %v406_v8 = vadd.f32 %v2293_v53, %v2271_v12 }
  0xeb   : > { %v1234_v59 = vpop.f32.mrf.mxu0 }
  0xf0   : > { %v981_v62 = vpop.f32.mrf.mxu2  ;;  %v1076_v63 = vpop.f32.mrf.mxu3 }
  0xf1   : > { %v888_v1 = vpop.f32.mrf.mxu1  ;;  %v1001_v2 = vadd.f32 %v981_v62, %v906_v61 }
  0xf2   : > { %v907_v6 = vadd.f32 %v888_v1, %v749_v4 }
  0xf3   : > { %v1236_v3 = vpop.f32.mrf.mxu0  ;;  %v1096_v5 = vadd.f32 %v1076_v63, %v1001_v2 }
  0xf5   : > { %v1254_v10 = vadd.f32 %v1234_v59, %v1096_v5  ;;  %v563_v59 = vadd.f32 %v2281_v47, %v404_v57  ;;  %v564_v47 = vadd.f32 %v2289_v51, %v405_v11  ;;  %v565_v51 = vadd.f32 %v2297_v55, %v406_v8 }
  0xf7   : > { %v1308_v22 = vmul.f32 %v1254_v10, %v1254_v10 }
  0xf8   : > { %v983_v7 = vpop.f32.mrf.mxu2  ;;  %v1078_v13 = vpop.f32.mrf.mxu3 }
  0xf9   : > { %v1002_v14 = vadd.f32 %v983_v7, %v907_v6  ;;  %v891_v15 = vpop.f32.mrf.mxu1 }
  0xfa   : > { %v908_v25 = vadd.f32 %v891_v15, %v750_v34 }
  0xfb   : > { %v1097_v17 = vadd.f32 %v1078_v13, %v1002_v14  ;;  %v1239_v18 = vpop.f32.mrf.mxu0 }
  0xfd   : > { %v1255_v20 = vadd.f32 %v1236_v3, %v1097_v17  ;;  %v658_v3 = vadd.f32 %v2283_v48, %v563_v59  ;;  %v659_v48 = vadd.f32 %v2291_v52, %v564_v47 }
  0xff   : > { %v1800_v23 = vpack.c.bf16 %v1255_v20, %v1254_v10  ;;  %v1294_v21 = vadd.f32 %v1255_v20, %v1254_v10  ;;  %v1309_v24 = vmul.f32 %v1255_v20, %v1255_v20  ;;  %v753_v13 = vadd.f32 %v2277_v45, %v658_v3 }
 0x100   : > { %v986_v26 = vpop.f32.mrf.mxu2  ;;  %v1081_v27 = vpop.f32.mrf.mxu3  ;;  %v754_v45 = vadd.f32 %v2287_v50, %v659_v48 }
 0x101   : > { %v1316_v29 = vadd.f32 %v1309_v24, %v1308_v22  ;;  %v1003_v30 = vadd.f32 %v986_v26, %v908_v25  ;;  %v893_v32 = vpop.f32.mrf.mxu1  ;;  %1801 = vst [vmem:[%s2306_s10] sm:$0xff] %v1800_v23  }
 0x102   : > { %v909_v40 = vadd.f32 %v893_v32, %v751_v35 }
 0x103   : > { %v1098_v9 = vadd.f32 %v1081_v27, %v1003_v30  ;;  %v1241_v31 = vpop.f32.mrf.mxu0  ;;  %v660_v27 = vadd.f32 %v2299_v56, %v565_v51 }
 0x105   : > { %v1256_v37 = vadd.f32 %v1239_v18, %v1098_v9  ;;  %v755_v32 = vadd.f32 %v2295_v54, %v660_v27 }
 0x107   : > { %v1295_v38 = vadd.f32 %v1294_v21, %v1256_v37  ;;  %v1310_v39 = vmul.f32 %v1256_v37, %v1256_v37 }
 0x108   : > { %v988_v41 = vpop.f32.mrf.mxu2  ;;  %v1083_v34 = vpop.f32.mrf.mxu3 }
 0x109   : > { %v1317_v42 = vadd.f32 %v1316_v29, %v1310_v39  ;;  %v1004_v44 = vadd.f32 %v988_v41, %v909_v40  ;;  %v896_v36 = vpop.f32.mrf.mxu1 }
 0x10a   : > { %v910_v0 = vadd.f32 %v896_v36, %v2279_v46 }
 0x10b   : > { %v1099_v58 = vadd.f32 %v1083_v34, %v1004_v44  ;;  %v1244_v61 = vpop.f32.mrf.mxu0 }
 0x10d   : > { %v1257_v60 = vadd.f32 %v1241_v31, %v1099_v58 }
 0x10f   : > { %v1805_v62 = vpack.c.bf16 %v1257_v60, %v1256_v37  ;;  %v1296_v63 = vadd.f32 %v1295_v38, %v1257_v60  ;;  %v1311_v33 = vmul.f32 %v1257_v60, %v1257_v60 }
 0x110   : > { %v991_v1 = vpop.f32.mrf.mxu2  ;;  %v1086_v2 = vpop.f32.mrf.mxu3 }
 0x111   : > { %v1318_v4 = vadd.f32 %v1317_v42, %v1311_v33  ;;  %v1005_v5 = vadd.f32 %v991_v1, %v910_v0  ;;  %v898_v6 = vpop.f32.mrf.mxu1  ;;  %1817 = vst [vmem:[%s2306_s10 + $0x8] sm:$0xff] %v1805_v62  }
 0x112   : > { %v911_v46 = vadd.f32 %v898_v6, %v753_v13 }
 0x113   : > { %v1100_v43 = vadd.f32 %v1086_v2, %v1005_v5  ;;  %v1246_v10 = vpop.f32.mrf.mxu0 }
 0x115   : > { %v1258_v7 = vadd.f32 %v1244_v61, %v1100_v43 }
 0x117   : > { %v1297_v14 = vadd.f32 %v1296_v63, %v1258_v7  ;;  %v1312_v15 = vmul.f32 %v1258_v7, %v1258_v7 }
 0x118   : > { %v993_v16 = vpop.f32.mrf.mxu2  ;;  %v1088_v17 = vpop.f32.mrf.mxu3 }
 0x119   : > { %v1319_v18 = vadd.f32 %v1318_v4, %v1312_v15  ;;  %v1006_v19 = vadd.f32 %v993_v16, %v911_v46  ;;  %v901_v20 = vpop.f32.mrf.mxu1 }
 0x11a   : > { %v912_v25 = vadd.f32 %v901_v20, %v754_v45 }
 0x11b   : > { %v1101_v49 = vadd.f32 %v1088_v17, %v1006_v19  ;;  %v1249_v12 = vpop.f32.mrf.mxu0 }
 0x11d   : > { %v1259_v22 = vadd.f32 %v1246_v10, %v1101_v49 }
 0x11f   : > { %v1810_v23 = vpack.c.bf16 %v1259_v22, %v1258_v7  ;;  %v1298_v21 = vadd.f32 %v1297_v14, %v1259_v22  ;;  %v1313_v24 = vmul.f32 %v1259_v22, %v1259_v22 }
 0x120   : > { %v996_v26 = vpop.f32.mrf.mxu2  ;;  %v1091_v52 = vpop.f32.mrf.mxu3 }
 0x121   : > { %v1320_v28 = vadd.f32 %v1319_v18, %v1313_v24  ;;  %v1007_v29 = vadd.f32 %v996_v26, %v912_v25  ;;  %1818 = vst [vmem:[%s2306_s10 + $0x10] sm:$0xff] %v1810_v23   ;;  %v903_v30 = vpop.f32.mrf.mxu1 }
 0x122   : > { %v913_v31 = vadd.f32 %v903_v30, %v755_v32 }
 0x123   : > { %v1102_v53 = vadd.f32 %v1091_v52, %v1007_v29  ;;  %v1251_v40 = vpop.f32.mrf.mxu0 }
 0x125   : > { %v1260_v55 = vadd.f32 %v1249_v12, %v1102_v53 }
 0x127   : > { %v1299_v50 = vadd.f32 %v1298_v21, %v1260_v55  ;;  %v1314_v9 = vmul.f32 %v1260_v55, %v1260_v55 }
 0x128   : > { %v998_v37 = vpop.f32.mrf.mxu2  ;;  %v1093_v56 = vpop.f32.mrf.mxu3 }
 0x129   : > { %v1321_v35 = vadd.f32 %v1320_v28, %v1314_v9  ;;  %v1008_v38 = vadd.f32 %v998_v37, %v913_v31 }
 0x12b   : > { %v1103_v39 = vadd.f32 %v1093_v56, %v1008_v38 }
 0x12d   : > { %v1261_v54 = vadd.f32 %v1251_v40, %v1103_v39 }
 0x12f   : > { %v1815_v41 = vpack.c.bf16 %v1261_v54, %v1260_v55  ;;  %v1300_v34 = vadd.f32 %v1299_v50, %v1261_v54  ;;  %v1315_v42 = vmul.f32 %v1261_v54, %v1261_v54 }
 0x131   : > { %v1301_v44 = vrot.slane %v1300_v34, 4  ;;  %v1322_v36 = vadd.f32 %v1321_v35, %v1315_v42  ;;  %1819 = vst [vmem:[%s2306_s10 + $0x18] sm:$0xff] %v1815_v41  }
 0x132   : > { %1902 = shalt.err (!%p1899_p3)
}
 0x133   : > { %s1999_s10 = smov 64   ;;  %s2000_s11 = smov 4   ;;  %v1302_v57 = vadd.f32 %v1301_v44, %v1300_v34  ;;  %v1323_v58 = vrot.slane %v1322_v36, 4 }
 0x134   : > { %1824 = dma.vmem_to_hbm [thread:$0]  (%p2066_p5), %s1352_s22, 512, %s1354_s23, %s1331_s27, %s1999_s10, %s1999_s10, %s2000_s11  }
 0x135   : > { %v1324_v59 = vadd.f32 %v1323_v58, %v1322_v36  ;;  %v1303_v60 = vrot.slane %v1302_v57, 2  ;;  %s1365_s14 = scalar_lea.hbm %s2416_s3, %s2047_s19  ;;  %s1335_s28 = sand.u32 1, %s2047_s19  }
 0x136   : > { %s1378_s5 = scalar_lea.hbm %s2417_s4, %s2047_s19  ;;  %s203_s6 = scalar_lea.vmem [#allocation5], %s2302_s8 }
 0x137   : > { %v1304_v61 = vadd.f32 %v1303_v60, %v1302_v57  ;;  %v1325_v62 = vrot.slane %v1324_v59, 2  ;;  %s2355_s7 = sshll.u32 %s203_s6, 4  ;;  %s2357_s22 = sshll.u32 %s1365_s14, 4  ;;  %s1368_s7 = int_to_ptr.vmem [resolvable:$true] %s2355_s7  ;;  %s1370_s22 = int_to_ptr.hbm [resolvable:$true] %s2357_s22 }
 0x138   : > { %s209_s23 = scalar_lea.vmem [#allocation7], %s2302_s8  ;;  %s2362_s9 = sshll.u32 %s1378_s5, 4  ;;  %s1383_s9 = int_to_ptr.hbm [resolvable:$true] %s2362_s9 }
 0x139   : > { %v1305_v63 = vrot.slane %v1304_v61, 1  ;;  %v1326_v33 = vadd.f32 %v1325_v62, %v1324_v59  ;;  %s2360_s27 = sshll.u32 %s209_s23, 4  ;;  %s1336_s19 = scalar_lea.sflag [#allocation6], %s1335_s28  ;;  %s1381_s27 = int_to_ptr.vmem [resolvable:$true] %s2360_s27 }
 0x13a   : > { %s1917_s10 = sshra.s32 %s1370_s22, 4  ;;  %s1923_s13 = scalar_lea.hbm %s2416_s3, 2  ;;  %s1918_s10 = int_to_ptr.hbm [resolvable:$true] %s1917_s10 }
 0x13b   : > { %v1306_v0 = vadd.f32 %v1305_v63, %v1304_v61  ;;  %v1327_v1 = vrot.slane %v1326_v33, 1  ;;  %s1919_s11 = scalar_lea.hbm %s1918_s10, 1  ;;  %p1924_p9 = scmp.lt.s32.totalorder %s1918_s10, %s2416_s3 }
 0x13c   : > { %p1920_p4 = scmp.ne.s32.totalorder %s1918_s10, %s1919_s11  ;;  %p1925_p10 = scmp.lt.s32.totalorder %s1923_s13, %s1919_s11 }
 0x13d   : > { %1307 = vst [vmem:[%s203_s6] sm:$0x1] %v1306_v0  ;;  %v1328_v2 = vadd.f32 %v1327_v1, %v1326_v33 }
 0x13e   : > { %p1921_p7 = pnand %p1920_p4, %p2066_p5  ;;  %p1926_p11 = por %p1925_p10, %p1924_p9 }
 0x140   : > { %p1922_p8 = pneg %p1921_p7 }
 0x142   : > { %p1927_p12 = pnand %p1926_p11, %p1922_p8 }
 0x144   : > { %1930 = shalt.err (!%p1927_p12)
}
 0x145   : > { %1825 = dma.vmem_to_hbm [thread:$0]  (%p2066_p5), %s1368_s7, 16, %s1370_s22, %s1336_s19   ;;  %1329 = vst [vmem:[%s209_s23] sm:$0x1] %v1328_v2 }
 0x146   : > { %s1945_s28 = sshra.s32 %s1383_s9, 4  ;;  %s1951_s10 = scalar_lea.hbm %s2417_s4, 2  ;;  %s1946_s28 = int_to_ptr.hbm [resolvable:$true] %s1945_s28 }
 0x147   : > { %s1947_s30 = scalar_lea.hbm %s1946_s28, 1  ;;  %p1952_p2 = scmp.lt.s32.totalorder %s1946_s28, %s2417_s4 }
 0x148   : > { %p1948_p13 = scmp.ne.s32.totalorder %s1946_s28, %s1947_s30  ;;  %p1953_p3 = scmp.lt.s32.totalorder %s1951_s10, %s1947_s30 }
 0x14a   : > { %p1949_p0 = pnand %p1948_p13, %p2066_p5  ;;  %p1954_p4 = por %p1953_p3, %p1952_p2 }
 0x14c   : > { %p1950_p1 = pneg %p1949_p0 }
 0x14e   : > { %p1955_p7 = pnand %p1954_p4, %p1950_p1 }
 0x150   : > { %1958 = shalt.err (!%p1955_p7)
}
 0x151   : > { %1826 = dma.vmem_to_hbm [thread:$0]  (%p2066_p5), %s1381_s27, 16, %s1383_s9, %s1336_s19  }
 0x152 PF: > { %p1840_p8 = scmp.ge.s32.totalorder %s1997_s18, 2  ;;  %s1394_s7 = sand.u32 1, %s1985_s15  }
 0x153   : > { %s1395_s22 = scalar_lea.sflag [#allocation4], %s1394_s7 }
 0x154   : > { %p1831_p9 = pnand %p1840_p8, %p2070_p6 }
 0x156   : > { %p1832_p10 = pneg %p1831_p9 }
 0x158   : > { %1976 = dma.done.wait (%p1832_p10), %s1395_s22, 512  }
 0x159   : > { %1978 = vsyncadd (%p1832_p10), %s1395_s22, 4294966784  ;;  %s1404_s25 = sand.u32 1, %s1495_s20  }
 0x15a   : > { %s1405_s23 = scalar_lea.sflag [#allocation6], %s1404_s25 }
 0x15b   : > { %1980 = dma.done.wait (%p1832_p10), %s1405_s23, 32  }
 0x15c   : > { %1982 = vsyncadd (%p1832_p10), %s1405_s23, 4294967264  ;;  %p18_p5 = scmp.ge.s32.totalorder %s2051_s21, 4   ;;  %s2420_s15 = smov %s1989_s16 }
 0x15d   : > { %s2421_s16 = smov %s1993_s17  ;;  %s2422_s17 = smov %s2064_s24 }
 0x15e   : > { %s2423_s18 = smov %s2051_s21  ;;  %20 = sbr.rel (!%p18_p5) target bundleno = 5 (0x5), region = 108 }
 0x163   :  { %1419 = vsyncpa [#allocation4], 1 }
 0x164   :  { %1421 = vsyncpa [#allocation4 + $0x1], 1 }
 0x165   :  { %1422 = vsyncpa [#allocation6], 1 }
 0x166   :  { %1424 = vsyncpa [#allocation6 + $0x1], 1 }

</bundles_post_ra>
